<compile_context>
chip_gen: v5e
topology: v5e:2x2
jax: 0.10.0
libtpu: 0.0.40
codegen_flags: <defaults>
</compile_context>

<pallas_src>
import jax
import jax.numpy as jnp
import numpy as np
from jax.experimental import pallas as pl
from jax.experimental.pallas import tpu as pltpu


def _round_up(x, m):
    return (x + m - 1) // m * m


# ---------------------------------------------------------------------------
# Kernel A: conv1 + relu + 2x2 maxpool as ONE block-diagonal im2col matmul.
#   p_ref : (tm, 128)  packed patches, lane = g*32 + k  (g = pool offset, k<25)
#   w_ref : (128, 128) block-diagonal conv1 weight (4 copies of (25->6) block)
#   b_ref : (1, 32)    bias (6 useful lanes)
#   o_ref : (tm, 32)   relu(maxpool(conv1(x)))  (6 useful lanes)
# ---------------------------------------------------------------------------
def _conv1_relu_pool_kernel(p_ref, w_ref, b_ref, o_ref):
    z = jnp.dot(p_ref[...], w_ref[...], preferred_element_type=jnp.float32)
    # 2x2 max-pool = max over the four 32-lane groups (one per pool offset).
    # Bias-add / relu after the max is valid (monotone, bias shared).
    h = jnp.maximum(jnp.maximum(z[:, 0:32], z[:, 32:64]),
                    jnp.maximum(z[:, 64:96], z[:, 96:128]))
    o_ref[...] = jnp.maximum(h + b_ref[...], 0.0).astype(o_ref.dtype)


def conv1_relu_pool(patches, w_bd, b, tm):
    Mp, KL = patches.shape          # (M_pad, 128)
    NL = b.shape[1]                 # 32
    return pl.pallas_call(
        _conv1_relu_pool_kernel,
        out_shape=jax.ShapeDtypeStruct((Mp, NL), jnp.float32),
        grid=(Mp // tm,),
        in_specs=[
            pl.BlockSpec((tm, KL), lambda i: (i, 0)),
            pl.BlockSpec((KL, KL), lambda i: (0, 0)),
            pl.BlockSpec((1, NL), lambda i: (0, 0)),
        ],
        out_specs=pl.BlockSpec((tm, NL), lambda i: (i, 0)),
        compiler_params=pltpu.CompilerParams(
            dimension_semantics=("parallel",)),
    )(patches, w_bd, b)


# ---------------------------------------------------------------------------
# Kernel B: conv2 + relu + 2x2 maxpool + channel-major flatten + fc1 + relu,
# fused, batch-tiled.
#   p_ref : (64*tb, 256) conv2 im2col patches for one batch tile; rows ordered
#                        (pool offset g, pooled position p, local batch b).
#   w2_ref: (256, 128)   b2_ref: (1, 128)   (16 useful output channels)
#   wf_ref: (256, 128)   fc1 weight, rows permuted to index p*16 + c
#   bf_ref: (1, 128)     o_ref : (tb, 128)  (120 useful lanes)
#   hf_ref: (tb, 256)    VMEM scratch holding the flattened pooled activations
# ---------------------------------------------------------------------------
def _conv2_pool_fc_kernel(p_ref, w2_ref, b2_ref, wf_ref, bf_ref, o_ref, hf_ref):
    tb = o_ref.shape[0]
    P = 16                                   # pooled 4x4 positions
    m = P * tb                               # rows per pool-offset group (mult of 8)

    # conv2 for all 4 pool offsets and all P positions: one lane-dense matmul.
    z = jnp.dot(p_ref[...], w2_ref[...], preferred_element_type=jnp.float32)

    # 2x2 max-pool = max over the 4 aligned row slabs; shared bias + relu after.
    h = jnp.maximum(jnp.maximum(z[0 * m:1 * m], z[1 * m:2 * m]),
                    jnp.maximum(z[2 * m:3 * m], z[3 * m:4 * m]))
    h = jnp.maximum(h + b2_ref[...], 0.0)    # (P*tb, 128), rows ordered (p, b)

    # Channel-major flatten: scatter the 16 useful lanes of each pooled-position
    # slab into the (tb, 256) scratch at lane offset p*16 (static offsets; all
    # row slabs are multiples of 8 rows -> free views).
    for p in range(P):
        hf_ref[:, p * 16:(p + 1) * 16] = h[p * tb:(p + 1) * tb, 0:16]

    # fc1 as a single K=256 MXU matmul.
    out = jnp.dot(hf_ref[...], wf_ref[...], preferred_element_type=jnp.float32)
    o_ref[...] = jnp.maximum(out + bf_ref[...], 0.0).astype(o_ref.dtype)


def conv2_pool_fc(patches2d, w2, b2, wf, bf, tb):
    R, K2 = patches2d.shape                  # R = T * 64 * tb, K2 = 256
    NL = wf.shape[1]                         # 128
    Bp = R // 64                             # padded batch
    T = Bp // tb
    return pl.pallas_call(
        _conv2_pool_fc_kernel,
        out_shape=jax.ShapeDtypeStruct((Bp, NL), jnp.float32),
        grid=(T,),
        in_specs=[
            pl.BlockSpec((64 * tb, K2), lambda i: (i, 0)),
            pl.BlockSpec((K2, NL), lambda i: (0, 0)),
            pl.BlockSpec((1, NL), lambda i: (0, 0)),
            pl.BlockSpec((K2, NL), lambda i: (0, 0)),
            pl.BlockSpec((1, NL), lambda i: (0, 0)),
        ],
        out_specs=pl.BlockSpec((tb, NL), lambda i: (i, 0)),
        scratch_shapes=[pltpu.VMEM((tb, 256), jnp.float32)],
        compiler_params=pltpu.CompilerParams(
            dimension_semantics=("parallel",)),
    )(patches2d, w2, b2, wf, bf)


# ---------------------------------------------------------------------------
# Wrapper-side patch extraction (a handful of XLA ops per stage).
# ---------------------------------------------------------------------------
def _pooled_patch_groups(x, k, batch_major=True):
    """x: (B, C, H, W) NCHW -> (4, M, C*k*k) im2col patches at the conv positions
    of a VALID kxk conv followed by a 2x2/stride-2 max pool.  Leading axis is the
    pool offset g = dh*2 + dw.  Row order per group is (b, ph, pw) if batch_major
    else (ph, pw, b).  Feature index = c*k*k + kh*k + kw (matches OIHW flatten)."""
    B, C, H, W = x.shape
    Hc, Wc = H - k + 1, W - k + 1
    Hp, Wp = Hc // 2, Wc // 2
    K = C * k * k
    pat = jax.lax.conv_general_dilated_patches(
        x, (k, k), (1, 1), "VALID",
        dimension_numbers=("NCHW", "OIHW", "NCHW"),
        precision=jax.lax.Precision.HIGHEST)         # (B, K, Hc, Wc)
    groups = []
    for dh in range(2):
        for dw in range(2):
            g = pat[:, :, dh::2, dw::2]              # (B, K, Hp, Wp)
            if batch_major:
                g = g.transpose(0, 2, 3, 1)          # (B, Hp, Wp, K)
            else:
                g = g.transpose(2, 3, 0, 1)          # (Hp, Wp, B, K)
            groups.append(g.reshape(-1, K))
    return jnp.stack(groups, axis=0)                 # (4, M, K)


# ---------------------------------------------------------------------------
# Forward pass (matches BaseCnn.forward)
# ---------------------------------------------------------------------------
def base_cnn_forward(x, params):
    w1, b1, w2, b2, wf, bf = params
    B = x.shape[0]

    # ---------------- stage 1: conv1 + relu + pool ----------------
    p1 = _pooled_patch_groups(x, 5, batch_major=True)             # (4, M, 25)
    M = p1.shape[1]                                               # B * 144
    p1 = jnp.pad(p1, ((0, 0), (0, 0), (0, 32 - 25)))              # (4, M, 32)
    p1 = p1.transpose(1, 0, 2).reshape(M, 128)                    # lane = g*32 + k

    tm = min(_round_up(M, 8), 2048)                               # big tiles, few steps
    Mp = _round_up(M, tm)
    p1 = jnp.pad(p1, ((0, Mp - M), (0, 0)))

    w1f = jnp.pad(w1.reshape(6, 25).T, ((0, 32 - 25), (0, 32 - 6)))   # (32, 32)
    w1bd = jnp.kron(jnp.eye(4, dtype=w1f.dtype), w1f)                 # (128, 128) block-diag
    b1p = jnp.pad(b1.reshape(1, 6), ((0, 0), (0, 32 - 6)))            # (1, 32)

    h1 = conv1_relu_pool(p1, w1bd, b1p, tm)                       # (Mp, 32)

    # ---------------- stage 1 -> stage 2 hop (wrapper-side im2col) ----------------
    h1 = h1[:M, :6].reshape(B, 12, 12, 6).transpose(0, 3, 1, 2)   # NCHW (B, 6, 12, 12)

    p2 = _pooled_patch_groups(h1, 5, batch_major=False)           # (4, 16*B, 150)
    K2 = p2.shape[-1]                                             # 150
    p2 = p2.reshape(4, 16, B, K2)                                 # [g, p, b, k]
    p2 = jnp.pad(p2, ((0, 0), (0, 0), (0, 0), (0, 256 - K2)))     # K -> 256 lanes

    tb = min(_round_up(B, 8), 32)                                 # batch tile (mult of 8)
    Bp = _round_up(B, tb)
    T = Bp // tb
    p2 = jnp.pad(p2, ((0, 0), (0, 0), (0, Bp - B), (0, 0)))       # (4, 16, Bp, 256)
    # Rows per batch tile ordered (g, p, local b): 2-D, fully tile-aligned slabs.
    p2 = (p2.reshape(4, 16, T, tb, 256)
            .transpose(2, 0, 1, 3, 4)
            .reshape(T * 4 * 16 * tb, 256))

    w2p = jnp.pad(w2.reshape(16, 150).T, ((0, 256 - 150), (0, 128 - 16)))   # (256, 128)
    b2p = jnp.pad(b2.reshape(1, 16), ((0, 0), (0, 128 - 16)))               # (1, 128)
    # fc1 weight permuted so its row index is p*16 + c (PyTorch flatten = c*16 + p).
    wfp = jnp.pad(wf.reshape(120, 16, 16).transpose(2, 1, 0).reshape(256, 120),
                  ((0, 0), (0, 128 - 120)))                                 # (256, 128)
    bfp = jnp.pad(bf.reshape(1, 120), ((0, 0), (0, 128 - 120)))             # (1, 128)

    outp = conv2_pool_fc(p2, w2p, b2p, wfp, bfp, tb)              # (Bp, 128)
    return outp[:B, :120]                                         # single final slice


# ---------------------------------------------------------------------------
# Pure-JAX reference (for correctness check)
# ---------------------------------------------------------------------------
def ref_forward(x, params):
    w1, b1, w2, b2, wf, bf = params

    def conv(a, w, b):
        y = jax.lax.conv_general_dilated(
            a, w, (1, 1), "VALID",
            dimension_numbers=("NCHW", "OIHW", "NCHW"),
            precision=jax.lax.Precision.HIGHEST)
        return y + b[None, :, None, None]

    def pool(a):
        return jax.lax.reduce_window(a, -jnp.inf, jax.lax.max,
                                     (1, 1, 2, 2), (1, 1, 2, 2), "VALID")

    h = pool(jax.nn.relu(conv(x, w1, b1)))
    h = pool(jax.nn.relu(conv(h, w2, b2)))
    h = h.reshape(h.shape[0], -1)
    return jax.nn.relu(jnp.dot(h, wf.T, precision=jax.lax.Precision.HIGHEST) + bf)


# ---------------------------------------------------------------------------
if __name__ == "__main__":
    key = jax.random.PRNGKey(0)
    ks = jax.random.split(key, 7)

    # Deterministic synthetic parameters (PyTorch shapes: conv OIHW, linear (out, in)).
    w1 = jax.random.normal(ks[0], (6, 1, 5, 5), jnp.float32) * 0.2
    b1 = jax.random.normal(ks[1], (6,), jnp.float32) * 0.1
    w2 = jax.random.normal(ks[2], (16, 6, 5, 5), jnp.float32) * 0.1
    b2 = jax.random.normal(ks[3], (16,), jnp.float32) * 0.1
    wf = jax.random.normal(ks[4], (120, 256), jnp.float32) * 0.05
    bf = jax.random.normal(ks[5], (120,), jnp.float32) * 0.1
    params = (w1, b1, w2, b2, wf, bf)

    # Smallest shape consistent with the module's 16*4*4 flatten: 28x28 input.
    x = jax.random.normal(ks[6], (2, 1, 28, 28), jnp.float32)

    out = jax.block_until_ready(jax.jit(base_cnn_forward)(x, params))
    ref = jax.block_until_ready(jax.jit(ref_forward)(x, params))

    assert out.shape == (2, 120) and out.dtype == jnp.float32
    np.testing.assert_allclose(np.asarray(out), np.asarray(ref),
                               rtol=2e-3, atol=2e-3)
    print("KERNEL_OK")
</pallas_src>

<mosaic_0001>
module attributes {stable_mosaic.version = 11 : i64} {
  func.func @_conv1_relu_pool_kernel(%arg0: i32, %arg1: memref<288x128xf32, #tpu.memory_space<vmem>>, %arg2: memref<128x128xf32, #tpu.memory_space<vmem>>, %arg3: memref<1x32xf32, #tpu.memory_space<vmem>>, %arg4: memref<288x32xf32, #tpu.memory_space<vmem>>) attributes {dimension_semantics = [#tpu.dimension_semantics<parallel>], iteration_bounds = array<i64: 1>, scalar_prefetch = 0 : i64, scratch_operands = 0 : i64, tpu.core_type = #tpu.core_type<tc>, window_params = [{transform_indices = @transform_0, window_bounds = array<i64: 288, 128>}, {pipeline_mode = #tpu.pipeline_mode<synchronous>, transform_indices = @transform_1, window_bounds = array<i64: 128, 128>}, {pipeline_mode = #tpu.pipeline_mode<synchronous>, transform_indices = @transform_2, window_bounds = array<i64: 1, 32>}, {transform_indices = @transform_3, window_bounds = array<i64: 288, 32>}]} {
    %c0 = arith.constant 0 : index
    %c0_0 = arith.constant 0 : index
    %0 = vector.load %arg1[%c0, %c0_0] : memref<288x128xf32, #tpu.memory_space<vmem>>, vector<288x128xf32>
    %c0_1 = arith.constant 0 : index
    %c0_2 = arith.constant 0 : index
    %1 = vector.load %arg2[%c0_1, %c0_2] : memref<128x128xf32, #tpu.memory_space<vmem>>, vector<128x128xf32>
    %cst = arith.constant dense<0.000000e+00> : vector<288x128xf32>
    %2 = tpu.matmul %0, %1, %cst {dimension_numbers = #tpu.dot_dimension_numbers<[1], [0], [0], [1], [0, 0, 1, 1], [], []>} : vector<288x128xf32>, vector<128x128xf32>, vector<288x128xf32> -> vector<288x128xf32>
    %3 = vector.extract_strided_slice %2 {offsets = [0, 0], sizes = [288, 32], strides = [1, 1]} : vector<288x128xf32> to vector<288x32xf32>
    %4 = vector.extract_strided_slice %2 {offsets = [0, 32], sizes = [288, 32], strides = [1, 1]} : vector<288x128xf32> to vector<288x32xf32>
    %5 = arith.maximumf %3, %4 : vector<288x32xf32>
    %6 = vector.extract_strided_slice %2 {offsets = [0, 64], sizes = [288, 32], strides = [1, 1]} : vector<288x128xf32> to vector<288x32xf32>
    %7 = vector.extract_strided_slice %2 {offsets = [0, 96], sizes = [288, 32], strides = [1, 1]} : vector<288x128xf32> to vector<288x32xf32>
    %8 = arith.maximumf %6, %7 : vector<288x32xf32>
    %9 = arith.maximumf %5, %8 : vector<288x32xf32>
    %c0_3 = arith.constant 0 : index
    %c0_4 = arith.constant 0 : index
    %10 = vector.load %arg3[%c0_3, %c0_4] : memref<1x32xf32, #tpu.memory_space<vmem>>, vector<1x32xf32>
    %11 = vector.broadcast %10 : vector<1x32xf32> to vector<288x32xf32>
    %12 = arith.addf %9, %11 : vector<288x32xf32>
    %cst_5 = arith.constant 0.000000e+00 : f32
    %13 = vector.broadcast %cst_5 : f32 to vector<288x32xf32>
    %14 = arith.maximumf %12, %13 : vector<288x32xf32>
    %c0_6 = arith.constant 0 : index
    %c0_7 = arith.constant 0 : index
    %15 = vector.load %arg4[%c0_6, %c0_7] : memref<288x32xf32, #tpu.memory_space<vmem>>, vector<288x32xf32>
    tpu.vector_store %arg4[%c0_6, %c0_7], %14 {strides = array<i32>} : memref<288x32xf32, #tpu.memory_space<vmem>>, vector<288x32xf32>,
    return
  }
  func.func @transform_0(%arg0: i32) -> (i32, i32) {
    %c0_i32 = arith.constant 0 : i32
    %c0_i32_0 = arith.constant 0 : i32
    return %arg0, %c0_i32 : i32, i32
  }
  func.func @transform_1(%arg0: i32) -> (i32, i32) {
    %c0_i32 = arith.constant 0 : i32
    %c0_i32_0 = arith.constant 0 : i32
    %c0_i32_1 = arith.constant 0 : i32
    return %c0_i32, %c0_i32_0 : i32, i32
  }
  func.func @transform_2(%arg0: i32) -> (i32, i32) {
    %c0_i32 = arith.constant 0 : i32
    %c0_i32_0 = arith.constant 0 : i32
    %c0_i32_1 = arith.constant 0 : i32
    return %c0_i32, %c0_i32_0 : i32, i32
  }
  func.func @transform_3(%arg0: i32) -> (i32, i32) {
    %c0_i32 = arith.constant 0 : i32
    %c0_i32_0 = arith.constant 0 : i32
    return %arg0, %c0_i32 : i32, i32
  }
}

module attributes {stable_mosaic.version = 11 : i64} {
  func.func @_conv2_pool_fc_kernel(%arg0: i32, %arg1: memref<512x256xf32, #tpu.memory_space<vmem>>, %arg2: memref<256x128xf32, #tpu.memory_space<vmem>>, %arg3: memref<1x128xf32, #tpu.memory_space<vmem>>, %arg4: memref<256x128xf32, #tpu.memory_space<vmem>>, %arg5: memref<1x128xf32, #tpu.memory_space<vmem>>, %arg6: memref<8x128xf32, #tpu.memory_space<vmem>>, %arg7: memref<8x256xf32, #tpu.memory_space<vmem>>) attributes {dimension_semantics = [#tpu.dimension_semantics<parallel>], iteration_bounds = array<i64: 1>, scalar_prefetch = 0 : i64, scratch_operands = 1 : i64, tpu.core_type = #tpu.core_type<tc>, window_params = [{transform_indices = @transform_0, window_bounds = array<i64: 512, 256>}, {pipeline_mode = #tpu.pipeline_mode<synchronous>, transform_indices = @transform_1, window_bounds = array<i64: 256, 128>}, {pipeline_mode = #tpu.pipeline_mode<synchronous>, transform_indices = @transform_2, window_bounds = array<i64: 1, 128>}, {pipeline_mode = #tpu.pipeline_mode<synchronous>, transform_indices = @transform_3, window_bounds = array<i64: 256, 128>}, {pipeline_mode = #tpu.pipeline_mode<synchronous>, transform_indices = @transform_4, window_bounds = array<i64: 1, 128>}, {transform_indices = @transform_5, window_bounds = array<i64: 8, 128>}]} {
    %c0 = arith.constant 0 : index
    %c0_0 = arith.constant 0 : index
    %0 = vector.load %arg1[%c0, %c0_0] : memref<512x256xf32, #tpu.memory_space<vmem>>, vector<512x256xf32>
    %c0_1 = arith.constant 0 : index
    %c0_2 = arith.constant 0 : index
    %1 = vector.load %arg2[%c0_1, %c0_2] : memref<256x128xf32, #tpu.memory_space<vmem>>, vector<256x128xf32>
    %cst = arith.constant dense<0.000000e+00> : vector<512x128xf32>
    %2 = tpu.matmul %0, %1, %cst {dimension_numbers = #tpu.dot_dimension_numbers<[1], [0], [0], [1], [0, 0, 1, 1], [], []>} : vector<512x256xf32>, vector<256x128xf32>, vector<512x128xf32> -> vector<512x128xf32>
    %3 = vector.extract_strided_slice %2 {offsets = [0, 0], sizes = [128, 128], strides = [1, 1]} : vector<512x128xf32> to vector<128x128xf32>
    %4 = vector.extract_strided_slice %2 {offsets = [128, 0], sizes = [128, 128], strides = [1, 1]} : vector<512x128xf32> to vector<128x128xf32>
    %5 = arith.maximumf %3, %4 : vector<128x128xf32>
    %6 = vector.extract_strided_slice %2 {offsets = [256, 0], sizes = [128, 128], strides = [1, 1]} : vector<512x128xf32> to vector<128x128xf32>
    %7 = vector.extract_strided_slice %2 {offsets = [384, 0], sizes = [128, 128], strides = [1, 1]} : vector<512x128xf32> to vector<128x128xf32>
    %8 = arith.maximumf %6, %7 : vector<128x128xf32>
    %9 = arith.maximumf %5, %8 : vector<128x128xf32>
    %c0_3 = arith.constant 0 : index
    %c0_4 = arith.constant 0 : index
    %10 = vector.load %arg3[%c0_3, %c0_4] : memref<1x128xf32, #tpu.memory_space<vmem>>, vector<1x128xf32>
    %11 = vector.broadcast %10 : vector<1x128xf32> to vector<128x128xf32>
    %12 = arith.addf %9, %11 : vector<128x128xf32>
    %cst_5 = arith.constant 0.000000e+00 : f32
    %13 = vector.broadcast %cst_5 : f32 to vector<128x128xf32>
    %14 = arith.maximumf %12, %13 : vector<128x128xf32>
    %15 = vector.extract_strided_slice %14 {offsets = [0, 0], sizes = [8, 16], strides = [1, 1]} : vector<128x128xf32> to vector<8x16xf32>
    %c0_6 = arith.constant 0 : index
    %c0_7 = arith.constant 0 : index
    %16 = vector.load %arg7[%c0_6, %c0_7] : memref<8x256xf32, #tpu.memory_space<vmem>>, vector<8x16xf32>
    tpu.vector_store %arg7[%c0_6, %c0_7], %15 {strides = array<i32>} : memref<8x256xf32, #tpu.memory_space<vmem>>, vector<8x16xf32>,
    %17 = vector.extract_strided_slice %14 {offsets = [8, 0], sizes = [8, 16], strides = [1, 1]} : vector<128x128xf32> to vector<8x16xf32>
    %c0_8 = arith.constant 0 : index
    %c16 = arith.constant 16 : index
    %18 = vector.load %arg7[%c0_8, %c16] : memref<8x256xf32, #tpu.memory_space<vmem>>, vector<8x16xf32>
    tpu.vector_store %arg7[%c0_8, %c16], %17 {strides = array<i32>} : memref<8x256xf32, #tpu.memory_space<vmem>>, vector<8x16xf32>,
    %19 = vector.extract_strided_slice %14 {offsets = [16, 0], sizes = [8, 16], strides = [1, 1]} : vector<128x128xf32> to vector<8x16xf32>
    %c0_9 = arith.constant 0 : index
    %c32 = arith.constant 32 : index
    %20 = vector.load %arg7[%c0_9, %c32] : memref<8x256xf32, #tpu.memory_space<vmem>>, vector<8x16xf32>
    tpu.vector_store %arg7[%c0_9, %c32], %19 {strides = array<i32>} : memref<8x256xf32, #tpu.memory_space<vmem>>, vector<8x16xf32>,
    %21 = vector.extract_strided_slice %14 {offsets = [24, 0], sizes = [8, 16], strides = [1, 1]} : vector<128x128xf32> to vector<8x16xf32>
    %c0_10 = arith.constant 0 : index
    %c48 = arith.constant 48 : index
    %22 = vector.load %arg7[%c0_10, %c48] : memref<8x256xf32, #tpu.memory_space<vmem>>, vector<8x16xf32>
    tpu.vector_store %arg7[%c0_10, %c48], %21 {strides = array<i32>} : memref<8x256xf32, #tpu.memory_space<vmem>>, vector<8x16xf32>,
    %23 = vector.extract_strided_slice %14 {offsets = [32, 0], sizes = [8, 16], strides = [1, 1]} : vector<128x128xf32> to vector<8x16xf32>
    %c0_11 = arith.constant 0 : index
    %c64 = arith.constant 64 : index
    %24 = vector.load %arg7[%c0_11, %c64] : memref<8x256xf32, #tpu.memory_space<vmem>>, vector<8x16xf32>
    tpu.vector_store %arg7[%c0_11, %c64], %23 {strides = array<i32>} : memref<8x256xf32, #tpu.memory_space<vmem>>, vector<8x16xf32>,
    %25 = vector.extract_strided_slice %14 {offsets = [40, 0], sizes = [8, 16], strides = [1, 1]} : vector<128x128xf32> to vector<8x16xf32>
    %c0_12 = arith.constant 0 : index
    %c80 = arith.constant 80 : index
    %26 = vector.load %arg7[%c0_12, %c80] : memref<8x256xf32, #tpu.memory_space<vmem>>, vector<8x16xf32>
    tpu.vector_store %arg7[%c0_12, %c80], %25 {strides = array<i32>} : memref<8x256xf32, #tpu.memory_space<vmem>>, vector<8x16xf32>,
    %27 = vector.extract_strided_slice %14 {offsets = [48, 0], sizes = [8, 16], strides = [1, 1]} : vector<128x128xf32> to vector<8x16xf32>
    %c0_13 = arith.constant 0 : index
    %c96 = arith.constant 96 : index
    %28 = vector.load %arg7[%c0_13, %c96] : memref<8x256xf32, #tpu.memory_space<vmem>>, vector<8x16xf32>
    tpu.vector_store %arg7[%c0_13, %c96], %27 {strides = array<i32>} : memref<8x256xf32, #tpu.memory_space<vmem>>, vector<8x16xf32>,
    %29 = vector.extract_strided_slice %14 {offsets = [56, 0], sizes = [8, 16], strides = [1, 1]} : vector<128x128xf32> to vector<8x16xf32>
    %c0_14 = arith.constant 0 : index
    %c112 = arith.constant 112 : index
    %30 = vector.load %arg7[%c0_14, %c112] : memref<8x256xf32, #tpu.memory_space<vmem>>, vector<8x16xf32>
    tpu.vector_store %arg7[%c0_14, %c112], %29 {strides = array<i32>} : memref<8x256xf32, #tpu.memory_space<vmem>>, vector<8x16xf32>,
    %31 = vector.extract_strided_slice %14 {offsets = [64, 0], sizes = [8, 16], strides = [1, 1]} : vector<128x128xf32> to vector<8x16xf32>
    %c0_15 = arith.constant 0 : index
    %c128 = arith.constant 128 : index
    %32 = vector.load %arg7[%c0_15, %c128] : memref<8x256xf32, #tpu.memory_space<vmem>>, vector<8x16xf32>
    tpu.vector_store %arg7[%c0_15, %c128], %31 {strides = array<i32>} : memref<8x256xf32, #tpu.memory_space<vmem>>, vector<8x16xf32>,
    %33 = vector.extract_strided_slice %14 {offsets = [72, 0], sizes = [8, 16], strides = [1, 1]} : vector<128x128xf32> to vector<8x16xf32>
    %c0_16 = arith.constant 0 : index
    %c144 = arith.constant 144 : index
    %34 = vector.load %arg7[%c0_16, %c144] : memref<8x256xf32, #tpu.memory_space<vmem>>, vector<8x16xf32>
    tpu.vector_store %arg7[%c0_16, %c144], %33 {strides = array<i32>} : memref<8x256xf32, #tpu.memory_space<vmem>>, vector<8x16xf32>,
    %35 = vector.extract_strided_slice %14 {offsets = [80, 0], sizes = [8, 16], strides = [1, 1]} : vector<128x128xf32> to vector<8x16xf32>
    %c0_17 = arith.constant 0 : index
    %c160 = arith.constant 160 : index
    %36 = vector.load %arg7[%c0_17, %c160] : memref<8x256xf32, #tpu.memory_space<vmem>>, vector<8x16xf32>
    tpu.vector_store %arg7[%c0_17, %c160], %35 {strides = array<i32>} : memref<8x256xf32, #tpu.memory_space<vmem>>, vector<8x16xf32>,
    %37 = vector.extract_strided_slice %14 {offsets = [88, 0], sizes = [8, 16], strides = [1, 1]} : vector<128x128xf32> to vector<8x16xf32>
    %c0_18 = arith.constant 0 : index
    %c176 = arith.constant 176 : index
    %38 = vector.load %arg7[%c0_18, %c176] : memref<8x256xf32, #tpu.memory_space<vmem>>, vector<8x16xf32>
    tpu.vector_store %arg7[%c0_18, %c176], %37 {strides = array<i32>} : memref<8x256xf32, #tpu.memory_space<vmem>>, vector<8x16xf32>,
    %39 = vector.extract_strided_slice %14 {offsets = [96, 0], sizes = [8, 16], strides = [1, 1]} : vector<128x128xf32> to vector<8x16xf32>
    %c0_19 = arith.constant 0 : index
    %c192 = arith.constant 192 : index
    %40 = vector.load %arg7[%c0_19, %c192] : memref<8x256xf32, #tpu.memory_space<vmem>>, vector<8x16xf32>
    tpu.vector_store %arg7[%c0_19, %c192], %39 {strides = array<i32>} : memref<8x256xf32, #tpu.memory_space<vmem>>, vector<8x16xf32>,
    %41 = vector.extract_strided_slice %14 {offsets = [104, 0], sizes = [8, 16], strides = [1, 1]} : vector<128x128xf32> to vector<8x16xf32>
    %c0_20 = arith.constant 0 : index
    %c208 = arith.constant 208 : index
    %42 = vector.load %arg7[%c0_20, %c208] : memref<8x256xf32, #tpu.memory_space<vmem>>, vector<8x16xf32>
    tpu.vector_store %arg7[%c0_20, %c208], %41 {strides = array<i32>} : memref<8x256xf32, #tpu.memory_space<vmem>>, vector<8x16xf32>,
    %43 = vector.extract_strided_slice %14 {offsets = [112, 0], sizes = [8, 16], strides = [1, 1]} : vector<128x128xf32> to vector<8x16xf32>
    %c0_21 = arith.constant 0 : index
    %c224 = arith.constant 224 : index
    %44 = vector.load %arg7[%c0_21, %c224] : memref<8x256xf32, #tpu.memory_space<vmem>>, vector<8x16xf32>
    tpu.vector_store %arg7[%c0_21, %c224], %43 {strides = array<i32>} : memref<8x256xf32, #tpu.memory_space<vmem>>, vector<8x16xf32>,
    %45 = vector.extract_strided_slice %14 {offsets = [120, 0], sizes = [8, 16], strides = [1, 1]} : vector<128x128xf32> to vector<8x16xf32>
    %c0_22 = arith.constant 0 : index
    %c240 = arith.constant 240 : index
    %46 = vector.load %arg7[%c0_22, %c240] : memref<8x256xf32, #tpu.memory_space<vmem>>, vector<8x16xf32>
    tpu.vector_store %arg7[%c0_22, %c240], %45 {strides = array<i32>} : memref<8x256xf32, #tpu.memory_space<vmem>>, vector<8x16xf32>,
    %c0_23 = arith.constant 0 : index
    %c0_24 = arith.constant 0 : index
    %47 = vector.load %arg7[%c0_23, %c0_24] : memref<8x256xf32, #tpu.memory_space<vmem>>, vector<8x256xf32>
    %c0_25 = arith.constant 0 : index
    %c0_26 = arith.constant 0 : index
    %48 = vector.load %arg4[%c0_25, %c0_26] : memref<256x128xf32, #tpu.memory_space<vmem>>, vector<256x128xf32>
    %cst_27 = arith.constant dense<0.000000e+00> : vector<8x128xf32>
    %49 = tpu.matmul %47, %48, %cst_27 {dimension_numbers = #tpu.dot_dimension_numbers<[1], [0], [0], [1], [0, 0, 1, 1], [], []>} : vector<8x256xf32>, vector<256x128xf32>, vector<8x128xf32> -> vector<8x128xf32>
    %c0_28 = arith.constant 0 : index
    %c0_29 = arith.constant 0 : index
    %50 = vector.load %arg5[%c0_28, %c0_29] : memref<1x128xf32, #tpu.memory_space<vmem>>, vector<1x128xf32>
    %51 = vector.broadcast %50 : vector<1x128xf32> to vector<8x128xf32>
    %52 = arith.addf %49, %51 : vector<8x128xf32>
    %cst_30 = arith.constant 0.000000e+00 : f32
    %53 = vector.broadcast %cst_30 : f32 to vector<8x128xf32>
    %54 = arith.maximumf %52, %53 : vector<8x128xf32>
    %c0_31 = arith.constant 0 : index
    %c0_32 = arith.constant 0 : index
    %55 = vector.load %arg6[%c0_31, %c0_32] : memref<8x128xf32, #tpu.memory_space<vmem>>, vector<8x128xf32>
    tpu.vector_store %arg6[%c0_31, %c0_32], %54 {strides = array<i32>} : memref<8x128xf32, #tpu.memory_space<vmem>>, vector<8x128xf32>,
    return
  }
  func.func @transform_0(%arg0: i32) -> (i32, i32) {
    %c0_i32 = arith.constant 0 : i32
    %c0_i32_0 = arith.constant 0 : i32
    return %arg0, %c0_i32 : i32, i32
  }
  func.func @transform_1(%arg0: i32) -> (i32, i32) {
    %c0_i32 = arith.constant 0 : i32
    %c0_i32_0 = arith.constant 0 : i32
    %c0_i32_1 = arith.constant 0 : i32
    return %c0_i32, %c0_i32_0 : i32, i32
  }
  func.func @transform_2(%arg0: i32) -> (i32, i32) {
    %c0_i32 = arith.constant 0 : i32
    %c0_i32_0 = arith.constant 0 : i32
    %c0_i32_1 = arith.constant 0 : i32
    return %c0_i32, %c0_i32_0 : i32, i32
  }
  func.func @transform_3(%arg0: i32) -> (i32, i32) {
    %c0_i32 = arith.constant 0 : i32
    %c0_i32_0 = arith.constant 0 : i32
    %c0_i32_1 = arith.constant 0 : i32
    return %c0_i32, %c0_i32_0 : i32, i32
  }
  func.func @transform_4(%arg0: i32) -> (i32, i32) {
    %c0_i32 = arith.constant 0 : i32
    %c0_i32_0 = arith.constant 0 : i32
    %c0_i32_1 = arith.constant 0 : i32
    return %c0_i32, %c0_i32_0 : i32, i32
  }
  func.func @transform_5(%arg0: i32) -> (i32, i32) {
    %c0_i32 = arith.constant 0 : i32
    %c0_i32_0 = arith.constant 0 : i32
    return %arg0, %c0_i32 : i32, i32
  }
}

</mosaic_0001>

<bundles_post_ra>
// kernel: base_cnn_forward.2
= control target key start
LH: loop header
LB: loop body
LE: loop exit
PB: predicated region body
PF: predicated region fallthrough
CT: control target
= control target key end

     0   :  { %s719_s5 = smov 96   ;;  %vm627_vm0 = vcmask 261120   ;;  %s1442_s1 = inlined_call_operand.vmem [shape: f32[128,128], index: 1, kind: input, shape index: {}]   ;;  %s1443_s0 = inlined_call_operand.vmem [shape: f32[288,128], index: 0, kind: input, shape index: {}]   ;;  %s1444_s2 = inlined_call_operand.vmem [shape: f32[1,32], index: 2, kind: input, shape index: {}]   ;;  %s1445_s3 = inlined_call_operand.vmem [shape: f32[288,32], index: 3, kind: output, shape index: {}]  }
   0x1   :  { %v65_v0 = vld [vmem:[%s1442_s1 + $0x78] sm:$0xff]  ;;  %v64_v1 = vld [vmem:[%s1442_s1 + $0x70] sm:$0xff]  ;;  %v63_v2 = vld [vmem:[%s1442_s1 + $0x68] sm:$0xff] }
   0x2   :  { %66 = vmatpush.msra.mxu0 %v65_v0  ;;  %668 = vmatpush.msra.mxu1 %v65_v0  ;;  %v62_v3 = vld [vmem:[%s1442_s1 + $0x60] sm:$0xff]  ;;  %v61_v4 = vld [vmem:[%s1442_s1 + $0x58] sm:$0xff]  ;;  %v60_v5 = vld [vmem:[%s1442_s1 + $0x50] sm:$0xff] }
   0x3   :  { %669 = vmatpush.msra.mxu2 %v65_v0  ;;  %670 = vmatpush.msra.mxu3 %v65_v0  ;;  %v59_v6 = vld [vmem:[%s1442_s1 + $0x48] sm:$0xff]  ;;  %v58_v7 = vld [vmem:[%s1442_s1 + $0x40] sm:$0xff]  ;;  %v57_v8 = vld [vmem:[%s1442_s1 + $0x38] sm:$0xff] }
   0x4   :  { %67 = vmatpush.msra.mxu0 %v64_v1  ;;  %671 = vmatpush.msra.mxu1 %v64_v1  ;;  %v56_v9 = vld [vmem:[%s1442_s1 + $0x30] sm:$0xff]  ;;  %v55_v10 = vld [vmem:[%s1442_s1 + $0x28] sm:$0xff]  ;;  %v54_v11 = vld [vmem:[%s1442_s1 + $0x20] sm:$0xff] }
   0x5   :  { %672 = vmatpush.msra.mxu2 %v64_v1  ;;  %673 = vmatpush.msra.mxu3 %v64_v1  ;;  %v53_v12 = vld [vmem:[%s1442_s1 + $0x18] sm:$0xff]  ;;  %v52_v13 = vld [vmem:[%s1442_s1 + $0x10] sm:$0xff]  ;;  %v51_v14 = vld [vmem:[%s1442_s1 + $0x8] sm:$0xff] }
   0x6   :  { %68 = vmatpush.msra.mxu0 %v63_v2  ;;  %674 = vmatpush.msra.mxu1 %v63_v2  ;;  %v50_v15 = vld [vmem:[%s1442_s1] sm:$0xff]  ;;  %v23_v17 = vld [vmem:[%s1443_s0 + $0x48] sm:$0xff]  ;;  %v32_v18 = vld [vmem:[%s1443_s0 + $0x90] sm:$0xff] }
   0x7   :  { %675 = vmatpush.msra.mxu2 %v63_v2  ;;  %676 = vmatpush.msra.mxu3 %v63_v2  ;;  %v14_v16 = vld [vmem:[%s1443_s0] sm:$0xff]  ;;  %v41_v19 = vld [vmem:[%s1443_s0 + $0xd8] sm:$0xff]  ;;  %v24_v20 = vld [vmem:[%s1443_s0 + $0x50] sm:$0xff] }
   0x8   :  { %69 = vmatpush.msra.mxu0 %v62_v3  ;;  %677 = vmatpush.msra.mxu1 %v62_v3  ;;  %v15_v21 = vld [vmem:[%s1443_s0 + $0x8] sm:$0xff]  ;;  %v33_v22 = vld [vmem:[%s1443_s0 + $0x98] sm:$0xff]  ;;  %v42_v23 = vld [vmem:[%s1443_s0 + $0xe0] sm:$0xff] }
   0x9   :  { %678 = vmatpush.msra.mxu2 %v62_v3  ;;  %679 = vmatpush.msra.mxu3 %v62_v3  ;;  %v25_v24 = vld [vmem:[%s1443_s0 + $0x58] sm:$0xff]  ;;  %v16_v25 = vld [vmem:[%s1443_s0 + $0x10] sm:$0xff]  ;;  %v34_v26 = vld [vmem:[%s1443_s0 + $0xa0] sm:$0xff] }
   0xa   :  { %70 = vmatpush.msra.mxu0 %v61_v4  ;;  %680 = vmatpush.msra.mxu1 %v61_v4  ;;  %v43_v27 = vld [vmem:[%s1443_s0 + $0xe8] sm:$0xff]  ;;  %v17_v28 = vld [vmem:[%s1443_s0 + $0x18] sm:$0xff]  ;;  %v26_v29 = vld [vmem:[%s1443_s0 + $0x60] sm:$0xff] }
   0xb   :  { %681 = vmatpush.msra.mxu2 %v61_v4  ;;  %682 = vmatpush.msra.mxu3 %v61_v4  ;;  %v35_v30 = vld [vmem:[%s1443_s0 + $0xa8] sm:$0xff]  ;;  %v44_v31 = vld [vmem:[%s1443_s0 + $0xf0] sm:$0xff]  ;;  %v18_v32 = vld [vmem:[%s1443_s0 + $0x20] sm:$0xff] }
   0xc   :  { %71 = vmatpush.msra.mxu0 %v60_v5  ;;  %683 = vmatpush.msra.mxu1 %v60_v5  ;;  %v27_v33 = vld [vmem:[%s1443_s0 + $0x68] sm:$0xff]  ;;  %v36_v34 = vld [vmem:[%s1443_s0 + $0xb0] sm:$0xff]  ;;  %v45_v35 = vld [vmem:[%s1443_s0 + $0xf8] sm:$0xff] }
   0xd   :  { %684 = vmatpush.msra.mxu2 %v60_v5  ;;  %685 = vmatpush.msra.mxu3 %v60_v5  ;;  %v19_v36 = vld [vmem:[%s1443_s0 + $0x28] sm:$0xff]  ;;  %v28_v37 = vld [vmem:[%s1443_s0 + $0x70] sm:$0xff]  ;;  %v37_v38 = vld [vmem:[%s1443_s0 + $0xb8] sm:$0xff] }
   0xe   :  { %72 = vmatpush.msra.mxu0 %v59_v6  ;;  %686 = vmatpush.msra.mxu1 %v59_v6  ;;  %v46_v39 = vld [vmem:[%s1443_s0 + $0x100] sm:$0xff]  ;;  %v20_v40 = vld [vmem:[%s1443_s0 + $0x30] sm:$0xff]  ;;  %v29_v41 = vld [vmem:[%s1443_s0 + $0x78] sm:$0xff] }
   0xf   :  { %687 = vmatpush.msra.mxu2 %v59_v6  ;;  %688 = vmatpush.msra.mxu3 %v59_v6  ;;  %v38_v42 = vld [vmem:[%s1443_s0 + $0xc0] sm:$0xff]  ;;  %v47_v43 = vld [vmem:[%s1443_s0 + $0x108] sm:$0xff]  ;;  %v21_v44 = vld [vmem:[%s1443_s0 + $0x38] sm:$0xff] }
  0x10   :  { %73 = vmatpush.msra.mxu0 %v58_v7  ;;  %689 = vmatpush.msra.mxu1 %v58_v7  ;;  %v30_v45 = vld [vmem:[%s1443_s0 + $0x80] sm:$0xff]  ;;  %v39_v46 = vld [vmem:[%s1443_s0 + $0xc8] sm:$0xff]  ;;  %v48_v47 = vld [vmem:[%s1443_s0 + $0x110] sm:$0xff] }
  0x11   :  { %690 = vmatpush.msra.mxu2 %v58_v7  ;;  %691 = vmatpush.msra.mxu3 %v58_v7  ;;  %v22_v48 = vld [vmem:[%s1443_s0 + $0x40] sm:$0xff]  ;;  %v31_v49 = vld [vmem:[%s1443_s0 + $0x88] sm:$0xff]  ;;  %v40_v50 = vld [vmem:[%s1443_s0 + $0xd0] sm:$0xff] }
  0x12   :  { %74 = vmatpush.msra.mxu0 %v57_v8  ;;  %692 = vmatpush.msra.mxu1 %v57_v8  ;;  %v49_v51 = vld [vmem:[%s1443_s0 + $0x118] sm:$0xff]  ;;  %s720_s0 = smov 64  }
  0x13   :  { %693 = vmatpush.msra.mxu2 %v57_v8  ;;  %694 = vmatpush.msra.mxu3 %v57_v8 }
  0x14   :  { %75 = vmatpush.msra.mxu0 %v56_v9  ;;  %695 = vmatpush.msra.mxu1 %v56_v9 }
  0x15   :  { %696 = vmatpush.msra.mxu2 %v56_v9  ;;  %697 = vmatpush.msra.mxu3 %v56_v9 }
  0x16   :  { %76 = vmatpush.msra.mxu0 %v55_v10  ;;  %698 = vmatpush.msra.mxu1 %v55_v10 }
  0x17   :  { %699 = vmatpush.msra.mxu2 %v55_v10  ;;  %700 = vmatpush.msra.mxu3 %v55_v10 }
  0x18   :  { %77 = vmatpush.msra.mxu0 %v54_v11  ;;  %701 = vmatpush.msra.mxu1 %v54_v11 }
  0x19   :  { %702 = vmatpush.msra.mxu2 %v54_v11  ;;  %703 = vmatpush.msra.mxu3 %v54_v11 }
  0x1a   :  { %78 = vmatpush.msra.mxu0 %v53_v12  ;;  %704 = vmatpush.msra.mxu1 %v53_v12 }
  0x1b   :  { %705 = vmatpush.msra.mxu2 %v53_v12  ;;  %706 = vmatpush.msra.mxu3 %v53_v12 }
  0x1c   :  { %79 = vmatpush.msra.mxu0 %v52_v13  ;;  %707 = vmatpush.msra.mxu1 %v52_v13 }
  0x1d   :  { %708 = vmatpush.msra.mxu2 %v52_v13  ;;  %709 = vmatpush.msra.mxu3 %v52_v13 }
  0x1e   :  { %80 = vmatpush.msra.mxu0 %v51_v14  ;;  %710 = vmatpush.msra.mxu1 %v51_v14 }
  0x1f   :  { %711 = vmatpush.msra.mxu2 %v51_v14  ;;  %712 = vmatpush.msra.mxu3 %v51_v14 }
  0x20   :  { %81 = vmatpush.msra.mxu0 %v50_v15  ;;  %713 = vmatpush.msra.mxu1 %v50_v15 }
  0x21   :  { %82 = vmatmul.f32.vlgmr.msra.gmra.mxu0 %v14_v16  ;;  %109 = vmatmul.f32.vlgmr.msra.gmra.mxu1 %v23_v17 }
  0x22   :  { %714 = vmatpush.msra.mxu2 %v50_v15  ;;  %715 = vmatpush.msra.mxu3 %v50_v15 }
  0x23   :  { %136 = vmatmul.f32.vlgmr.msra.gmra.mxu2 %v32_v18  ;;  %163 = vmatmul.f32.vlgmr.msra.gmra.mxu3 %v41_v19 }
  0x29   :  { %112 = vmatmul.f32.gmra.mxu1 %v24_v20  ;;  %85 = vmatmul.f32.gmra.mxu0 %v15_v21 }
  0x2b   :  { %139 = vmatmul.f32.gmra.mxu2 %v33_v22  ;;  %166 = vmatmul.f32.gmra.mxu3 %v42_v23 }
  0x31   :  { %115 = vmatmul.f32.gmra.mxu1 %v25_v24  ;;  %88 = vmatmul.f32.gmra.mxu0 %v16_v25 }
  0x33   :  { %142 = vmatmul.f32.gmra.mxu2 %v34_v26  ;;  %169 = vmatmul.f32.gmra.mxu3 %v43_v27 }
  0x39   :  { %91 = vmatmul.f32.gmra.mxu0 %v17_v28  ;;  %118 = vmatmul.f32.gmra.mxu1 %v26_v29 }
  0x3b   :  { %145 = vmatmul.f32.gmra.mxu2 %v35_v30  ;;  %172 = vmatmul.f32.gmra.mxu3 %v44_v31 }
  0x41   :  { %94 = vmatmul.f32.gmra.mxu0 %v18_v32  ;;  %121 = vmatmul.f32.gmra.mxu1 %v27_v33 }
  0x43   :  { %148 = vmatmul.f32.gmra.mxu2 %v36_v34  ;;  %175 = vmatmul.f32.gmra.mxu3 %v45_v35 }
  0x49   :  { %97 = vmatmul.f32.gmra.mxu0 %v19_v36  ;;  %124 = vmatmul.f32.gmra.mxu1 %v28_v37 }
  0x4b   :  { %151 = vmatmul.f32.gmra.mxu2 %v37_v38  ;;  %178 = vmatmul.f32.gmra.mxu3 %v46_v39 }
  0x51   :  { %100 = vmatmul.f32.gmra.mxu0 %v20_v40  ;;  %127 = vmatmul.f32.gmra.mxu1 %v29_v41 }
  0x53   :  { %154 = vmatmul.f32.gmra.mxu2 %v38_v42  ;;  %181 = vmatmul.f32.gmra.mxu3 %v47_v43 }
  0x59   :  { %103 = vmatmul.f32.gmra.mxu0 %v21_v44  ;;  %130 = vmatmul.f32.gmra.mxu1 %v30_v45 }
  0x5b   :  { %157 = vmatmul.f32.gmra.mxu2 %v39_v46  ;;  %184 = vmatmul.f32.gmra.mxu3 %v48_v47 }
  0x61   :  { %106 = vmatmul.f32.gmra.mxu0 %v22_v48  ;;  %133 = vmatmul.f32.gmra.mxu1 %v31_v49 }
  0x63   :  { %160 = vmatmul.f32.gmra.mxu2 %v40_v50  ;;  %187 = vmatmul.f32.gmra.mxu3 %v49_v51 }
  0x9e   :  { %v897_v52 = vpop.f32.mrf.mxu0  ;;  %v899_v53 = vpop.f32.mrf.mxu1 }
  0x9f   :  { %227 = vrot.lane.b32.xlu0 %v897_v52, %s719_s5 }
  0xa6   :  { %v903_v54 = vpop.f32.mrf.mxu1  ;;  %v905_v55 = vpop.f32.mrf.mxu2 }
  0xa7   :  { %247 = vrot.lane.b32.xlu1 %v903_v54, %s719_s5  ;;  %245 = vrot.lane.b32.xlu0 %v899_v53, %s719_s5  ;;  %v911_v56 = vpop.f32.mrf.mxu0  ;;  %v913_v57 = vpop.f32.mrf.mxu3 }
  0xae   :  { %v915_v58 = vpop.f32.mrf.mxu1  ;;  %v917_v59 = vpop.f32.mrf.mxu2 }
  0xaf   :  { %265 = vrot.lane.b32.xlu1 %v917_v59, %s719_s5  ;;  %249 = vrot.lane.b32.xlu2 %v915_v58, %s719_s5  ;;  %v923_v60 = vpop.f32.mrf.mxu0  ;;  %v927_v61 = vpop.f32.mrf.mxu3 }
  0xb0   :  { %263 = vrot.lane.b32.xlu0 %v905_v55, %s719_s5 }
  0xb6   :  { %v929_v62 = vpop.f32.mrf.mxu2  ;;  %v947_v1 = vpop.f32.mrf.mxu1 }
  0xb7   :  { %283 = vrot.lane.b32.xlu1 %v927_v61, %s719_s5  ;;  %267 = vrot.lane.b32.xlu2 %v929_v62, %s719_s5  ;;  %v937_v63 = vpop.f32.mrf.mxu0  ;;  %v939_v0 = vpop.f32.mrf.mxu3 }
  0xb8   :  { %281 = vrot.lane.b32.xlu0 %v913_v57, %s719_s5 }
  0xbe   :  { %v957_v3 = vpop.f32.mrf.mxu2  ;;  %v959_v4 = vpop.f32.mrf.mxu1 }
  0xbf   :  { %285 = vrot.lane.b32.xlu2 %v939_v0, %s719_s5  ;;  %231 = vrot.lane.b32.xlu1 %v923_v60, %s719_s5  ;;  %v949_v2 = vpop.f32.mrf.mxu0  ;;  %v969_v6 = vpop.f32.mrf.mxu3 }
  0xc0   :  { %229 = vrot.lane.b32.xlu0 %v911_v56, %s719_s5 }
  0xc6   :  { %v971_v7 = vpop.f32.mrf.mxu2  ;;  %v973_v8 = vpop.f32.mrf.mxu1 }
  0xc7   :  { %233 = vrot.lane.b32.xlu1 %v937_v63, %s719_s5  ;;  %235 = vrot.lane.b32.xlu2 %v949_v2, %s719_s5  ;;  %v961_v5 = vpop.f32.mrf.mxu0  ;;  %v983_v10 = vpop.f32.mrf.mxu3 }
  0xc8   :  { %251 = vrot.lane.b32.xlu0 %v947_v1, %s719_s5 }
  0xce   :  { %v985_v11 = vpop.f32.mrf.mxu2  ;;  %v993_v12 = vpop.f32.mrf.mxu1 }
  0xcf   :  { %253 = vrot.lane.b32.xlu1 %v959_v4, %s719_s5  ;;  %237 = vrot.lane.b32.xlu2 %v961_v5, %s719_s5  ;;  %v981_v9 = vpop.f32.mrf.mxu0  ;;  %v997_v14 = vpop.f32.mrf.mxu3 }
  0xd0   :  { %269 = vrot.lane.b32.xlu0 %v957_v3, %s719_s5 }
  0xd6   :  { %v1005_v15 = vpop.f32.mrf.mxu2  ;;  %v1007_v16 = vpop.f32.mrf.mxu1 }
  0xd7   :  { %271 = vrot.lane.b32.xlu1 %v971_v7, %s719_s5  ;;  %255 = vrot.lane.b32.xlu2 %v973_v8, %s719_s5  ;;  %v995_v13 = vpop.f32.mrf.mxu0  ;;  %v1017_v18 = vpop.f32.mrf.mxu3 }
  0xd8   :  { %287 = vrot.lane.b32.xlu0 %v969_v6, %s719_s5 }
  0xde   :  { %v1019_v19 = vpop.f32.mrf.mxu2  ;;  %v1021_v20 = vpop.f32.mrf.mxu1 }
  0xdf   :  { %289 = vrot.lane.b32.xlu1 %v983_v10, %s719_s5  ;;  %273 = vrot.lane.b32.xlu2 %v985_v11, %s719_s5  ;;  %v1009_v17 = vpop.f32.mrf.mxu0  ;;  %v1029_v21 = vpop.f32.mrf.mxu3 }
  0xe0   :  { %239 = vrot.lane.b32.xlu0 %v981_v9, %s719_s5 }
  0xe6   :  { %v1031_v22 = vpop.f32.mrf.mxu2 }
  0xe7   :  { %291 = vrot.lane.b32.xlu2 %v997_v14, %s719_s5  ;;  %241 = vrot.lane.b32.xlu1 %v995_v13, %s719_s5  ;;  %v1037_v23 = vpop.f32.mrf.mxu3 }
  0xe8   :  { %257 = vrot.lane.b32.xlu0 %v993_v12, %s719_s5 }
  0xef   :  { %259 = vrot.lane.b32.xlu1 %v1007_v16, %s719_s5  ;;  %243 = vrot.lane.b32.xlu2 %v1009_v17, %s719_s5 }
  0xf0   :  { %275 = vrot.lane.b32.xlu0 %v1005_v15, %s719_s5 }
  0xf7   :  { %277 = vrot.lane.b32.xlu1 %v1019_v19, %s719_s5  ;;  %261 = vrot.lane.b32.xlu2 %v1021_v20, %s719_s5 }
  0xf8   :  { %293 = vrot.lane.b32.xlu0 %v1017_v18, %s719_s5 }
  0xff   :  { %295 = vrot.lane.b32.xlu1 %v1029_v21, %s719_s5  ;;  %279 = vrot.lane.b32.xlu2 %v1031_v22, %s719_s5 }
 0x107   :  { %297 = vrot.lane.b32.xlu2 %v1037_v23, %s719_s5 }
 0x109   :  { %v250_v26 = vpop.permute.xlu2 %249 }
 0x10a   :  { %v1072_v44 = vmax.f32 %v915_v58, %v250_v26 }
 0x111   :  { %v228_v24 = vpop.permute.xlu0 %227  ;;  %v268_v31 = vpop.permute.xlu2 %267 }
 0x112   :  { %v1042_v25 = vmax.f32 %v897_v52, %v228_v24  ;;  %v1087_v49 = vmax.f32 %v929_v62, %v268_v31 }
 0x114   :  { %407 = vrot.lane.b32.xlu0 %v1042_v25, %s720_s0 }
 0x119   :  { %v248_v27 = vpop.permute.xlu1 %247  ;;  %v246_v28 = vpop.permute.xlu0 %245 }
 0x11a   :  { %v1047_v29 = vmax.f32 %v899_v53, %v246_v28  ;;  %v286_v37 = vpop.permute.xlu2 %285  ;;  %v1078_v47 = vmax.f32 %v903_v54, %v248_v27 }
 0x11b   :  { %v1102_v53 = vmax.f32 %v939_v0, %v286_v37 }
 0x11c   :  { %425 = vrot.lane.b32.xlu0 %v1047_v29, %s720_s0 }
 0x121   :  { %v266_v30 = vpop.permute.xlu1 %265 }
 0x122   :  { %v264_v32 = vpop.permute.xlu0 %263  ;;  %v236_v42 = vpop.permute.xlu2 %235  ;;  %v1093_v52 = vmax.f32 %v917_v59, %v266_v30 }
 0x123   :  { %v1052_v33 = vmax.f32 %v905_v55, %v264_v32 }
 0x125   :  { %443 = vrot.lane.b32.xlu0 %v1052_v33, %s720_s0 }
 0x129   :  { %v284_v34 = vpop.permute.xlu1 %283 }
 0x12a   :  { %v282_v35 = vpop.permute.xlu0 %281  ;;  %v238_v48 = vpop.permute.xlu2 %237 }
 0x12b   :  { %v1057_v36 = vmax.f32 %v913_v57, %v282_v35  ;;  %v1108_v57 = vmax.f32 %v927_v61, %v284_v34  ;;  %v1117_v59 = vmax.f32 %v961_v5, %v238_v48  ;;  %v1123_v61 = vmax.f32 %v949_v2, %v236_v42 }
 0x12d   :  { %461 = vrot.lane.b32.xlu0 %v1057_v36, %s720_s0 }
 0x131   :  { %v232_v38 = vpop.permute.xlu1 %231 }
 0x132   :  { %v230_v39 = vpop.permute.xlu0 %229  ;;  %v1062_v40 = vmax.f32 %v923_v60, %v232_v38  ;;  %v256_v54 = vpop.permute.xlu2 %255 }
 0x133   :  { %v1065_v41 = vmax.f32 %v911_v56, %v230_v39 }
 0x134   :  { %411 = vrot.lane.b32.xlu2 %v1062_v40, %s720_s0 }
 0x135   :  { %409 = vrot.lane.b32.xlu1 %v1065_v41, %s720_s0 }
 0x139   :  { %v234_v43 = vpop.permute.xlu1 %233 }
 0x13a   :  { %v252_v45 = vpop.permute.xlu0 %251  ;;  %v1075_v46 = vmax.f32 %v937_v63, %v234_v43  ;;  %v274_v63 = vpop.permute.xlu2 %273 }
 0x13b   :  { %v1090_v50 = vmax.f32 %v947_v1, %v252_v45  ;;  %v1132_v1 = vmax.f32 %v973_v8, %v256_v54  ;;  %v1147_v8 = vmax.f32 %v985_v11, %v274_v63 }
 0x13c   :  { %413 = vrot.lane.b32.xlu0 %v1075_v46, %s720_s0  ;;  %429 = vrot.lane.b32.xlu2 %v1072_v44, %s720_s0 }
 0x13d   :  { %427 = vrot.lane.b32.xlu1 %v1078_v47, %s720_s0 }
 0x141   :  { %v254_v58 = vpop.permute.xlu1 %253 }
 0x142   :  { %v270_v51 = vpop.permute.xlu0 %269  ;;  %v1138_v2 = vmax.f32 %v959_v4, %v254_v58 }
 0x143   :  { %v1105_v55 = vmax.f32 %v957_v3, %v270_v51 }
 0x144   :  { %431 = vrot.lane.b32.xlu0 %v1090_v50, %s720_s0  ;;  %447 = vrot.lane.b32.xlu2 %v1087_v49, %s720_s0 }
 0x145   :  { %445 = vrot.lane.b32.xlu1 %v1093_v52, %s720_s0 }
 0x149   :  { %v272_v0 = vpop.permute.xlu1 %271 }
 0x14a   :  { %v288_v56 = vpop.permute.xlu0 %287  ;;  %v1153_v4 = vmax.f32 %v971_v7, %v272_v0 }
 0x14b   :  { %v1120_v60 = vmax.f32 %v969_v6, %v288_v56  ;;  %v292_v6 = vpop.permute.xlu2 %291 }
 0x14c   :  { %449 = vrot.lane.b32.xlu0 %v1105_v55, %s720_s0  ;;  %465 = vrot.lane.b32.xlu2 %v1102_v53, %s720_s0  ;;  %v1162_v11 = vmax.f32 %v997_v14, %v292_v6 }
 0x14d   :  { %463 = vrot.lane.b32.xlu1 %v1108_v57, %s720_s0 }
 0x151   :  { %v290_v24 = vpop.permute.xlu1 %289 }
 0x152   :  { %v240_v62 = vpop.permute.xlu0 %239  ;;  %v1168_v7 = vmax.f32 %v983_v10, %v290_v24 }
 0x153   :  { %v1135_v3 = vmax.f32 %v981_v9, %v240_v62  ;;  %v244_v27 = vpop.permute.xlu2 %243 }
 0x154   :  { %467 = vrot.lane.b32.xlu0 %v1120_v60, %s720_s0  ;;  %417 = vrot.lane.b32.xlu2 %v1117_v59, %s720_s0  ;;  %v1177_v14 = vmax.f32 %v1009_v17, %v244_v27 }
 0x155   :  { %415 = vrot.lane.b32.xlu1 %v1123_v61, %s720_s0 }
 0x159   :  { %v242_v28 = vpop.permute.xlu1 %241 }
 0x15a   :  { %v258_v5 = vpop.permute.xlu0 %257  ;;  %v1183_v10 = vmax.f32 %v995_v13, %v242_v28 }
 0x15b   :  { %v1150_v9 = vmax.f32 %v993_v12, %v258_v5  ;;  %v262_v31 = vpop.permute.xlu2 %261 }
 0x15c   :  { %419 = vrot.lane.b32.xlu0 %v1135_v3, %s720_s0  ;;  %435 = vrot.lane.b32.xlu2 %v1132_v1, %s720_s0  ;;  %v1192_v17 = vmax.f32 %v1021_v20, %v262_v31 }
 0x15d   :  { %433 = vrot.lane.b32.xlu1 %v1138_v2, %s720_s0 }
 0x161   :  { %v260_v32 = vpop.permute.xlu1 %259 }
 0x162   :  { %v276_v26 = vpop.permute.xlu0 %275  ;;  %v1195_v34 = vmax.f32 %v1007_v16, %v260_v32  ;;  %v1214_v16 = vld [vmem:[%s1444_s2] ss:$0 sm:$0xff] }
 0x163   :  { %v1165_v12 = vmax.f32 %v1005_v15, %v276_v26 }
 0x164   :  { %437 = vrot.lane.b32.xlu0 %v1150_v9, %s720_s0  ;;  %453 = vrot.lane.b32.xlu2 %v1147_v8, %s720_s0 }
 0x165   :  { %451 = vrot.lane.b32.xlu1 %v1153_v4, %s720_s0 }
 0x169   :  { %v278_v13 = vpop.permute.xlu1 %277 }
 0x16a   :  { %v294_v30 = vpop.permute.xlu0 %293  ;;  %v1205_v37 = vmax.f32 %v1019_v19, %v278_v13 }
 0x16b   :  { %v1180_v15 = vmax.f32 %v1017_v18, %v294_v30  ;;  %v280_v18 = vpop.permute.xlu2 %279 }
 0x16c   :  { %455 = vrot.lane.b32.xlu0 %v1165_v12, %s720_s0  ;;  %471 = vrot.lane.b32.xlu2 %v1162_v11, %s720_s0  ;;  %v1202_v35 = vmax.f32 %v1031_v22, %v280_v18 }
 0x16d   :  { %469 = vrot.lane.b32.xlu1 %v1168_v7, %s720_s0 }
 0x171   :  { %v296_v22 = vpop.permute.xlu1 %295 }
 0x172   :  { %v1222_v43 = vmax.f32 %v1029_v21, %v296_v22 }
 0x173   :  { %v298_v20 = vpop.permute.xlu2 %297 }
 0x174   :  { %473 = vrot.lane.b32.xlu0 %v1180_v15, %s720_s0  ;;  %423 = vrot.lane.b32.xlu2 %v1177_v14, %s720_s0  ;;  %v1219_v19 = vmax.f32 %v1037_v23, %v298_v20 }
 0x175   :  { %421 = vrot.lane.b32.xlu1 %v1183_v10, %s720_s0 }
 0x17c   :  { %441 = vrot.lane.b32.xlu2 %v1192_v17, %s720_s0 }
 0x17d   :  { %439 = vrot.lane.b32.xlu1 %v1195_v34, %s720_s0 }
 0x184   :  { %459 = vrot.lane.b32.xlu2 %v1202_v35, %s720_s0 }
 0x185   :  { %457 = vrot.lane.b32.xlu1 %v1205_v37, %s720_s0 }
 0x186   :  { %v408_v38 = vpop.permute.xlu0 %407 }
 0x187   :  { %v515_v39 = vmax.f32 %v1042_v25, %v408_v38 }
 0x189   :  { %v555_v42 = vadd.f32 %v1214_v16, %v515_v39 }
 0x18b   :  { %v591_v45 = vmax.f32 %v555_v42, 0.0 }
 0x18c   :  { %477 = vrot.lane.b32.xlu2 %v1219_v19, %s720_s0 }
 0x18d   :  { %628 = vst.msk [vmem:[%s1445_s3] sm:$0xff] %vm627_vm0, %v591_v45  ;;  %475 = vrot.lane.b32.xlu1 %v1222_v43, %s720_s0 }
 0x18e   :  { %v412_v25 = vpop.permute.xlu2 %411  ;;  %v426_v48 = vpop.permute.xlu0 %425 }
 0x18f   :  { %v517_v23 = vmax.f32 %v1062_v40, %v412_v25  ;;  %v524_v51 = vmax.f32 %v1047_v29, %v426_v48 }
 0x191   :  { %v557_v21 = vadd.f32 %v1214_v16, %v517_v23  ;;  %v564_v54 = vadd.f32 %v1214_v16, %v524_v51 }
 0x193   :  { %v593_v56 = vmax.f32 %v557_v21, 0.0  ;;  %v600_v58 = vmax.f32 %v564_v54, 0.0 }
 0x195   :  { %630 = vst.msk [vmem:[%s1445_s3 + $0x10] sm:$0xff] %vm627_vm0, %v593_v56 }
 0x196   :  { %637 = vst.msk [vmem:[%s1445_s3 + $0x48] sm:$0xff] %vm627_vm0, %v600_v58  ;;  %v430_v62 = vpop.permute.xlu2 %429 }
 0x197   :  { %v444_v40 = vpop.permute.xlu0 %443  ;;  %v526_v29 = vmax.f32 %v1072_v44, %v430_v62 }
 0x198   :  { %v533_v63 = vmax.f32 %v1052_v33, %v444_v40 }
 0x199   :  { %v566_v0 = vadd.f32 %v1214_v16, %v526_v29 }
 0x19a   :  { %v573_v5 = vadd.f32 %v1214_v16, %v533_v63 }
 0x19b   :  { %v602_v6 = vmax.f32 %v566_v0, 0.0 }
 0x19c   :  { %v609_v24 = vmax.f32 %v573_v5, 0.0 }
 0x19d   :  { %639 = vst.msk [vmem:[%s1445_s3 + $0x58] sm:$0xff] %vm627_vm0, %v602_v6 }
 0x19e   :  { %646 = vst.msk [vmem:[%s1445_s3 + $0x90] sm:$0xff] %vm627_vm0, %v609_v24  ;;  %v448_v26 = vpop.permute.xlu2 %447 }
 0x19f   :  { %v462_v44 = vpop.permute.xlu0 %461  ;;  %v535_v33 = vmax.f32 %v1087_v49, %v448_v26 }
 0x1a0   :  { %v542_v27 = vmax.f32 %v1057_v36, %v462_v44 }
 0x1a1   :  { %v575_v28 = vadd.f32 %v1214_v16, %v535_v33 }
 0x1a2   :  { %v582_v30 = vadd.f32 %v1214_v16, %v542_v27 }
 0x1a3   :  { %v611_v31 = vmax.f32 %v575_v28, 0.0 }
 0x1a4   :  { %v618_v32 = vmax.f32 %v582_v30, 0.0 }
 0x1a5   :  { %648 = vst.msk [vmem:[%s1445_s3 + $0xa0] sm:$0xff] %vm627_vm0, %v611_v31 }
 0x1a6   :  { %655 = vst.msk [vmem:[%s1445_s3 + $0xd8] sm:$0xff] %vm627_vm0, %v618_v32  ;;  %v466_v18 = vpop.permute.xlu2 %465 }
 0x1a7   :  { %v410_v49 = vpop.permute.xlu1 %409  ;;  %v544_v36 = vmax.f32 %v1102_v53, %v466_v18 }
 0x1a8   :  { %v516_v13 = vmax.f32 %v1065_v41, %v410_v49 }
 0x1a9   :  { %v584_v20 = vadd.f32 %v1214_v16, %v544_v36 }
 0x1aa   :  { %v556_v38 = vadd.f32 %v1214_v16, %v516_v13 }
 0x1ab   :  { %v620_v39 = vmax.f32 %v584_v20, 0.0 }
 0x1ac   :  { %v592_v22 = vmax.f32 %v556_v38, 0.0 }
 0x1ad   :  { %657 = vst.msk [vmem:[%s1445_s3 + $0xe8] sm:$0xff] %vm627_vm0, %v620_v39 }
 0x1ae   :  { %629 = vst.msk [vmem:[%s1445_s3 + $0x8] sm:$0xff] %vm627_vm0, %v592_v22  ;;  %v414_v42 = vpop.permute.xlu0 %413  ;;  %v418_v53 = vpop.permute.xlu2 %417 }
 0x1af   :  { %v518_v41 = vmax.f32 %v1075_v46, %v414_v42  ;;  %v428_v45 = vpop.permute.xlu1 %427  ;;  %v520_v25 = vmax.f32 %v1117_v59, %v418_v53 }
 0x1b0   :  { %v525_v48 = vmax.f32 %v1078_v47, %v428_v45 }
 0x1b1   :  { %v558_v23 = vadd.f32 %v1214_v16, %v518_v41  ;;  %v560_v51 = vadd.f32 %v1214_v16, %v520_v25 }
 0x1b2   :  { %v565_v21 = vadd.f32 %v1214_v16, %v525_v48 }
 0x1b3   :  { %v594_v54 = vmax.f32 %v558_v23, 0.0  ;;  %v596_v56 = vmax.f32 %v560_v51, 0.0 }
 0x1b4   :  { %v601_v58 = vmax.f32 %v565_v21, 0.0 }
 0x1b5   :  { %631 = vst.msk [vmem:[%s1445_s3 + $0x18] sm:$0xff] %vm627_vm0, %v594_v54 }
 0x1b6   :  { %638 = vst.msk [vmem:[%s1445_s3 + $0x50] sm:$0xff] %vm627_vm0, %v601_v58  ;;  %v432_v46 = vpop.permute.xlu0 %431  ;;  %v436_v47 = vpop.permute.xlu2 %435 }
 0x1b7   :  { %633 = vst.msk [vmem:[%s1445_s3 + $0x28] sm:$0xff] %vm627_vm0, %v596_v56  ;;  %v527_v59 = vmax.f32 %v1090_v50, %v432_v46  ;;  %v446_v62 = vpop.permute.xlu1 %445  ;;  %v529_v40 = vmax.f32 %v1132_v1, %v436_v47 }
 0x1b8   :  { %v534_v29 = vmax.f32 %v1093_v52, %v446_v62 }
 0x1b9   :  { %v567_v63 = vadd.f32 %v1214_v16, %v527_v59  ;;  %v569_v0 = vadd.f32 %v1214_v16, %v529_v40 }
 0x1ba   :  { %v574_v5 = vadd.f32 %v1214_v16, %v534_v29 }
 0x1bb   :  { %v603_v6 = vmax.f32 %v567_v63, 0.0  ;;  %v605_v24 = vmax.f32 %v569_v0, 0.0 }
 0x1bc   :  { %v610_v26 = vmax.f32 %v574_v5, 0.0 }
 0x1bd   :  { %640 = vst.msk [vmem:[%s1445_s3 + $0x60] sm:$0xff] %vm627_vm0, %v603_v6 }
 0x1be   :  { %647 = vst.msk [vmem:[%s1445_s3 + $0x98] sm:$0xff] %vm627_vm0, %v610_v26  ;;  %v450_v50 = vpop.permute.xlu0 %449  ;;  %v454_v52 = vpop.permute.xlu2 %453 }
 0x1bf   :  { %642 = vst.msk [vmem:[%s1445_s3 + $0x70] sm:$0xff] %vm627_vm0, %v605_v24  ;;  %v536_v1 = vmax.f32 %v1105_v55, %v450_v50  ;;  %v464_v44 = vpop.permute.xlu1 %463  ;;  %v538_v33 = vmax.f32 %v1147_v8, %v454_v52 }
 0x1c0   :  { %v543_v27 = vmax.f32 %v1108_v57, %v464_v44 }
 0x1c1   :  { %v576_v28 = vadd.f32 %v1214_v16, %v536_v1  ;;  %v578_v30 = vadd.f32 %v1214_v16, %v538_v33 }
 0x1c2   :  { %v583_v31 = vadd.f32 %v1214_v16, %v543_v27 }
 0x1c3   :  { %v612_v32 = vmax.f32 %v576_v28, 0.0  ;;  %v614_v18 = vmax.f32 %v578_v30, 0.0 }
 0x1c4   :  { %v619_v49 = vmax.f32 %v583_v31, 0.0 }
 0x1c5   :  { %649 = vst.msk [vmem:[%s1445_s3 + $0xa8] sm:$0xff] %vm627_vm0, %v612_v32 }
 0x1c6   :  { %656 = vst.msk [vmem:[%s1445_s3 + $0xe0] sm:$0xff] %vm627_vm0, %v619_v49  ;;  %v468_v55 = vpop.permute.xlu0 %467  ;;  %v472_v57 = vpop.permute.xlu2 %471 }
 0x1c7   :  { %651 = vst.msk [vmem:[%s1445_s3 + $0xb8] sm:$0xff] %vm627_vm0, %v614_v18  ;;  %v545_v8 = vmax.f32 %v1120_v60, %v468_v55  ;;  %v416_v36 = vpop.permute.xlu1 %415  ;;  %v547_v13 = vmax.f32 %v1162_v11, %v472_v57 }
 0x1c8   :  { %v519_v20 = vmax.f32 %v1123_v61, %v416_v36 }
 0x1c9   :  { %v585_v38 = vadd.f32 %v1214_v16, %v545_v8  ;;  %v587_v39 = vadd.f32 %v1214_v16, %v547_v13 }
 0x1ca   :  { %v559_v22 = vadd.f32 %v1214_v16, %v519_v20 }
 0x1cb   :  { %v621_v42 = vmax.f32 %v585_v38, 0.0  ;;  %v623_v53 = vmax.f32 %v587_v39, 0.0 }
 0x1cc   :  { %v595_v41 = vmax.f32 %v559_v22, 0.0 }
 0x1cd   :  { %658 = vst.msk [vmem:[%s1445_s3 + $0xf0] sm:$0xff] %vm627_vm0, %v621_v42 }
 0x1ce   :  { %632 = vst.msk [vmem:[%s1445_s3 + $0x20] sm:$0xff] %vm627_vm0, %v595_v41  ;;  %v420_v60 = vpop.permute.xlu0 %419  ;;  %v424_v61 = vpop.permute.xlu2 %423 }
 0x1cf   :  { %660 = vst.msk [vmem:[%s1445_s3 + $0x100] sm:$0xff] %vm627_vm0, %v623_v53  ;;  %v521_v11 = vmax.f32 %v1135_v3, %v420_v60  ;;  %v434_v45 = vpop.permute.xlu1 %433  ;;  %v523_v25 = vmax.f32 %v1177_v14, %v424_v61 }
 0x1d0   :  { %v528_v48 = vmax.f32 %v1138_v2, %v434_v45 }
 0x1d1   :  { %v561_v23 = vadd.f32 %v1214_v16, %v521_v11  ;;  %v563_v51 = vadd.f32 %v1214_v16, %v523_v25 }
 0x1d2   :  { %v568_v21 = vadd.f32 %v1214_v16, %v528_v48 }
 0x1d3   :  { %v597_v54 = vmax.f32 %v561_v23, 0.0  ;;  %v599_v56 = vmax.f32 %v563_v51, 0.0 }
 0x1d4   :  { %v604_v58 = vmax.f32 %v568_v21, 0.0 }
 0x1d5   :  { %634 = vst.msk [vmem:[%s1445_s3 + $0x30] sm:$0xff] %vm627_vm0, %v597_v54 }
 0x1d6   :  { %641 = vst.msk [vmem:[%s1445_s3 + $0x68] sm:$0xff] %vm627_vm0, %v604_v58  ;;  %v438_v3 = vpop.permute.xlu0 %437  ;;  %v442_v2 = vpop.permute.xlu2 %441 }
 0x1d7   :  { %636 = vst.msk [vmem:[%s1445_s3 + $0x40] sm:$0xff] %vm627_vm0, %v599_v56  ;;  %v530_v14 = vmax.f32 %v1150_v9, %v438_v3  ;;  %v452_v46 = vpop.permute.xlu1 %451  ;;  %v532_v47 = vmax.f32 %v1192_v17, %v442_v2 }
 0x1d8   :  { %v537_v59 = vmax.f32 %v1153_v4, %v452_v46 }
 0x1d9   :  { %v570_v62 = vadd.f32 %v1214_v16, %v530_v14  ;;  %v572_v40 = vadd.f32 %v1214_v16, %v532_v47 }
 0x1da   :  { %v577_v29 = vadd.f32 %v1214_v16, %v537_v59 }
 0x1db   :  { %v606_v63 = vmax.f32 %v570_v62, 0.0  ;;  %v608_v0 = vmax.f32 %v572_v40, 0.0 }
 0x1dc   :  { %v613_v5 = vmax.f32 %v577_v29, 0.0 }
 0x1dd   :  { %643 = vst.msk [vmem:[%s1445_s3 + $0x78] sm:$0xff] %vm627_vm0, %v606_v63 }
 0x1de   :  { %650 = vst.msk [vmem:[%s1445_s3 + $0xb0] sm:$0xff] %vm627_vm0, %v613_v5  ;;  %v456_v9 = vpop.permute.xlu0 %455  ;;  %v460_v4 = vpop.permute.xlu2 %459 }
 0x1df   :  { %645 = vst.msk [vmem:[%s1445_s3 + $0x88] sm:$0xff] %vm627_vm0, %v608_v0  ;;  %v539_v17 = vmax.f32 %v1165_v12, %v456_v9  ;;  %v470_v6 = vpop.permute.xlu1 %469  ;;  %v541_v24 = vmax.f32 %v1202_v35, %v460_v4 }
 0x1e0   :  { %v546_v26 = vmax.f32 %v1168_v7, %v470_v6 }
 0x1e1   :  { %v579_v50 = vadd.f32 %v1214_v16, %v539_v17  ;;  %v581_v52 = vadd.f32 %v1214_v16, %v541_v24 }
 0x1e2   :  { %v586_v1 = vadd.f32 %v1214_v16, %v546_v26 }
 0x1e3   :  { %v615_v44 = vmax.f32 %v579_v50, 0.0  ;;  %v617_v33 = vmax.f32 %v581_v52, 0.0 }
 0x1e4   :  { %v622_v27 = vmax.f32 %v586_v1, 0.0 }
 0x1e5   :  { %652 = vst.msk [vmem:[%s1445_s3 + $0xc0] sm:$0xff] %vm627_vm0, %v615_v44 }
 0x1e6   :  { %659 = vst.msk [vmem:[%s1445_s3 + $0xf8] sm:$0xff] %vm627_vm0, %v622_v27  ;;  %v474_v12 = vpop.permute.xlu0 %473  ;;  %v478_v7 = vpop.permute.xlu2 %477 }
 0x1e7   :  { %654 = vst.msk [vmem:[%s1445_s3 + $0xd0] sm:$0xff] %vm627_vm0, %v617_v33  ;;  %v548_v35 = vmax.f32 %v1180_v15, %v474_v12  ;;  %v422_v28 = vpop.permute.xlu1 %421  ;;  %v550_v30 = vmax.f32 %v1219_v19, %v478_v7 }
 0x1e8   :  { %v522_v31 = vmax.f32 %v1183_v10, %v422_v28 }
 0x1e9   :  { %v588_v32 = vadd.f32 %v1214_v16, %v548_v35  ;;  %v590_v18 = vadd.f32 %v1214_v16, %v550_v30 }
 0x1ea   :  { %v562_v49 = vadd.f32 %v1214_v16, %v522_v31 }
 0x1eb   :  { %v624_v55 = vmax.f32 %v588_v32, 0.0  ;;  %v626_v57 = vmax.f32 %v590_v18, 0.0 }
 0x1ec   :  { %v598_v8 = vmax.f32 %v562_v49, 0.0 }
 0x1ed   :  { %661 = vst.msk [vmem:[%s1445_s3 + $0x108] sm:$0xff] %vm627_vm0, %v624_v55 }
 0x1ee   :  { %635 = vst.msk [vmem:[%s1445_s3 + $0x38] sm:$0xff] %vm627_vm0, %v598_v8 }
 0x1ef   :  { %663 = vst.msk [vmem:[%s1445_s3 + $0x118] sm:$0xff] %vm627_vm0, %v626_v57  ;;  %v440_v15 = vpop.permute.xlu1 %439 }
 0x1f0   :  { %v531_v10 = vmax.f32 %v1195_v34, %v440_v15 }
 0x1f2   :  { %v571_v19 = vadd.f32 %v1214_v16, %v531_v10 }
 0x1f4   :  { %v607_v36 = vmax.f32 %v571_v19, 0.0 }
 0x1f6   :  { %644 = vst.msk [vmem:[%s1445_s3 + $0x80] sm:$0xff] %vm627_vm0, %v607_v36 }
 0x1f7   :  { %v458_v13 = vpop.permute.xlu1 %457 }
 0x1f8   :  { %v540_v20 = vmax.f32 %v1205_v37, %v458_v13 }
 0x1fa   :  { %v580_v38 = vadd.f32 %v1214_v16, %v540_v20 }
 0x1fc   :  { %v616_v39 = vmax.f32 %v580_v38, 0.0 }
 0x1fe   :  { %653 = vst.msk [vmem:[%s1445_s3 + $0xc8] sm:$0xff] %vm627_vm0, %v616_v39 }
 0x1ff   :  { %v476_v34 = vpop.permute.xlu1 %475 }
 0x200   :  { %v549_v22 = vmax.f32 %v1222_v43, %v476_v34 }
 0x202   :  { %v589_v42 = vadd.f32 %v1214_v16, %v549_v22 }
 0x204   :  { %v625_v53 = vmax.f32 %v589_v42, 0.0 }
 0x206   :  { %662 = vst.msk [vmem:[%s1445_s3 + $0x110] sm:$0xff] %vm627_vm0, %v625_v53 }

// kernel: base_cnn_forward.3
= control target key start
LH: loop header
LB: loop body
LE: loop exit
PB: predicated region body
PF: predicated region fallthrough
CT: control target
= control target key end

     0   :  { %s887_s15 = smov 16   ;;  %s888_s19 = smov 32   ;;  %vm682_vm0 = vcmask 130048   ;;  %vm688_vm1 = vcmask 261248   ;;  %vm694_vm2 = vcmask 392448   ;;  %vm700_vm3 = vcmask 523648   ;;  %s1686_s1 = inlined_call_operand.vmem [shape: f32[256,128], index: 1, kind: input, shape index: {}]   ;;  %s1687_s0 = inlined_call_operand.vmem [shape: f32[512,256], index: 0, kind: input, shape index: {}]   ;;  %s1688_s2 = inlined_call_operand.vmem [shape: f32[1,128], index: 2, kind: input, shape index: {}]   ;;  %s1689_s3 = inlined_call_operand.vmem [shape: f32[256,128], index: 3, kind: input, shape index: {}]   ;;  %s1690_s4 = inlined_call_operand.vmem [shape: f32[1,128], index: 4, kind: input, shape index: {}]   ;;  %s1691_s5 = inlined_call_operand.vmem [shape: f32[8,128], index: 5, kind: output, shape index: {}]  }
   0x1   :  { %v163_v0 = vld [vmem:[%s1686_s1 + $0x78] sm:$0xff]  ;;  %v162_v2 = vld [vmem:[%s1686_s1 + $0x70] sm:$0xff]  ;;  %v161_v4 = vld [vmem:[%s1686_s1 + $0x68] sm:$0xff]  ;;  %s889_s20 = smov 48   ;;  %s890_s25 = smov 64   ;;  %vm706_vm4 = vcmask 654848  }
   0x2   :  { %v179_v1 = vld [vmem:[%s1686_s1 + $0xf8] sm:$0xff]  ;;  %180 = vmatpush.msra.mxu0 %v163_v0  ;;  %846 = vmatpush.msra.mxu2 %v163_v0  ;;  %v178_v3 = vld [vmem:[%s1686_s1 + $0xf0] sm:$0xff]  ;;  %v177_v5 = vld [vmem:[%s1686_s1 + $0xe8] sm:$0xff]  ;;  %s891_s26 = smov 80   ;;  %s892_s6 = smov 96   ;;  %vm712_vm5 = vcmask 786048  }
   0x3   :  { %389 = vmatpush.msra.mxu1 %v179_v1  ;;  %862 = vmatpush.msra.mxu3 %v179_v1  ;;  %v160_v6 = vld [vmem:[%s1686_s1 + $0x60] sm:$0xff]  ;;  %v159_v8 = vld [vmem:[%s1686_s1 + $0x58] sm:$0xff]  ;;  %v158_v10 = vld [vmem:[%s1686_s1 + $0x50] sm:$0xff]  ;;  %s893_s7 = smov 112   ;;  %vm718_vm6 = vcmask 917248   ;;  %vm724_vm7 = vcmask 1048448  }
   0x4   :  { %181 = vmatpush.msra.mxu0 %v162_v2  ;;  %847 = vmatpush.msra.mxu2 %v162_v2  ;;  %v176_v7 = vld [vmem:[%s1686_s1 + $0xe0] sm:$0xff]  ;;  %v175_v9 = vld [vmem:[%s1686_s1 + $0xd8] sm:$0xff]  ;;  %v174_v11 = vld [vmem:[%s1686_s1 + $0xd0] sm:$0xff] }
   0x5   :  { %390 = vmatpush.msra.mxu1 %v178_v3  ;;  %863 = vmatpush.msra.mxu3 %v178_v3  ;;  %v157_v12 = vld [vmem:[%s1686_s1 + $0x48] sm:$0xff]  ;;  %v156_v14 = vld [vmem:[%s1686_s1 + $0x40] sm:$0xff]  ;;  %v155_v16 = vld [vmem:[%s1686_s1 + $0x38] sm:$0xff] }
   0x6   :  { %182 = vmatpush.msra.mxu0 %v161_v4  ;;  %848 = vmatpush.msra.mxu2 %v161_v4  ;;  %v173_v13 = vld [vmem:[%s1686_s1 + $0xc8] sm:$0xff]  ;;  %v172_v15 = vld [vmem:[%s1686_s1 + $0xc0] sm:$0xff]  ;;  %v171_v17 = vld [vmem:[%s1686_s1 + $0xb8] sm:$0xff] }
   0x7   :  { %391 = vmatpush.msra.mxu1 %v177_v5  ;;  %864 = vmatpush.msra.mxu3 %v177_v5  ;;  %v154_v18 = vld [vmem:[%s1686_s1 + $0x30] sm:$0xff]  ;;  %v153_v20 = vld [vmem:[%s1686_s1 + $0x28] sm:$0xff]  ;;  %v152_v22 = vld [vmem:[%s1686_s1 + $0x20] sm:$0xff] }
   0x8   :  { %183 = vmatpush.msra.mxu0 %v160_v6  ;;  %849 = vmatpush.msra.mxu2 %v160_v6  ;;  %v170_v19 = vld [vmem:[%s1686_s1 + $0xb0] sm:$0xff]  ;;  %v169_v21 = vld [vmem:[%s1686_s1 + $0xa8] sm:$0xff]  ;;  %v168_v23 = vld [vmem:[%s1686_s1 + $0xa0] sm:$0xff] }
   0x9   :  { %392 = vmatpush.msra.mxu1 %v176_v7  ;;  %865 = vmatpush.msra.mxu3 %v176_v7  ;;  %v151_v24 = vld [vmem:[%s1686_s1 + $0x18] sm:$0xff]  ;;  %v150_v26 = vld [vmem:[%s1686_s1 + $0x10] sm:$0xff]  ;;  %v149_v28 = vld [vmem:[%s1686_s1 + $0x8] sm:$0xff] }
   0xa   :  { %184 = vmatpush.msra.mxu0 %v159_v8  ;;  %850 = vmatpush.msra.mxu2 %v159_v8  ;;  %v167_v25 = vld [vmem:[%s1686_s1 + $0x98] sm:$0xff]  ;;  %v166_v27 = vld [vmem:[%s1686_s1 + $0x90] sm:$0xff]  ;;  %v165_v29 = vld [vmem:[%s1686_s1 + $0x88] sm:$0xff] }
   0xb   :  { %393 = vmatpush.msra.mxu1 %v175_v9  ;;  %866 = vmatpush.msra.mxu3 %v175_v9  ;;  %v148_v30 = vld [vmem:[%s1686_s1] sm:$0xff]  ;;  %v86_v33 = vld [vmem:[%s1687_s0 + $0x210] sm:$0xff]  ;;  %v21_v34 = vld [vmem:[%s1687_s0 + $0x8] sm:$0xff] }
   0xc   :  { %185 = vmatpush.msra.mxu0 %v158_v10  ;;  %851 = vmatpush.msra.mxu2 %v158_v10  ;;  %v164_v31 = vld [vmem:[%s1686_s1 + $0x80] sm:$0xff]  ;;  %v87_v35 = vld [vmem:[%s1687_s0 + $0x218] sm:$0xff]  ;;  %v22_v36 = vld [vmem:[%s1687_s0 + $0x10] sm:$0xff] }
   0xd   :  { %394 = vmatpush.msra.mxu1 %v174_v11  ;;  %867 = vmatpush.msra.mxu3 %v174_v11  ;;  %v20_v32 = vld [vmem:[%s1687_s0] sm:$0xff]  ;;  %v23_v38 = vld [vmem:[%s1687_s0 + $0x18] sm:$0xff]  ;;  %v89_v39 = vld [vmem:[%s1687_s0 + $0x228] sm:$0xff] }
   0xe   :  { %186 = vmatpush.msra.mxu0 %v157_v12  ;;  %852 = vmatpush.msra.mxu2 %v157_v12  ;;  %v88_v37 = vld [vmem:[%s1687_s0 + $0x220] sm:$0xff]  ;;  %v90_v41 = vld [vmem:[%s1687_s0 + $0x230] sm:$0xff]  ;;  %v25_v42 = vld [vmem:[%s1687_s0 + $0x28] sm:$0xff] }
   0xf   :  { %395 = vmatpush.msra.mxu1 %v173_v13  ;;  %868 = vmatpush.msra.mxu3 %v173_v13  ;;  %v24_v40 = vld [vmem:[%s1687_s0 + $0x20] sm:$0xff]  ;;  %v91_v43 = vld [vmem:[%s1687_s0 + $0x238] sm:$0xff]  ;;  %v26_v44 = vld [vmem:[%s1687_s0 + $0x30] sm:$0xff] }
  0x10   :  { %187 = vmatpush.msra.mxu0 %v156_v14  ;;  %853 = vmatpush.msra.mxu2 %v156_v14  ;;  %v92_v45 = vld [vmem:[%s1687_s0 + $0x240] sm:$0xff]  ;;  %v27_v46 = vld [vmem:[%s1687_s0 + $0x38] sm:$0xff]  ;;  %v93_v47 = vld [vmem:[%s1687_s0 + $0x248] sm:$0xff] }
  0x11   :  { %396 = vmatpush.msra.mxu1 %v172_v15  ;;  %869 = vmatpush.msra.mxu3 %v172_v15  ;;  %v28_v48 = vld [vmem:[%s1687_s0 + $0x40] sm:$0xff]  ;;  %v94_v49 = vld [vmem:[%s1687_s0 + $0x250] sm:$0xff]  ;;  %v29_v50 = vld [vmem:[%s1687_s0 + $0x48] sm:$0xff] }
  0x12   :  { %188 = vmatpush.msra.mxu0 %v155_v16  ;;  %854 = vmatpush.msra.mxu2 %v155_v16  ;;  %v95_v51 = vld [vmem:[%s1687_s0 + $0x258] sm:$0xff]  ;;  %v30_v52 = vld [vmem:[%s1687_s0 + $0x50] sm:$0xff]  ;;  %v96_v53 = vld [vmem:[%s1687_s0 + $0x260] sm:$0xff] }
  0x13   :  { %397 = vmatpush.msra.mxu1 %v171_v17  ;;  %870 = vmatpush.msra.mxu3 %v171_v17  ;;  %v31_v54 = vld [vmem:[%s1687_s0 + $0x58] sm:$0xff]  ;;  %v97_v55 = vld [vmem:[%s1687_s0 + $0x268] sm:$0xff]  ;;  %v32_v56 = vld [vmem:[%s1687_s0 + $0x60] sm:$0xff] }
  0x14   :  { %189 = vmatpush.msra.mxu0 %v154_v18  ;;  %855 = vmatpush.msra.mxu2 %v154_v18  ;;  %v98_v57 = vld [vmem:[%s1687_s0 + $0x270] sm:$0xff]  ;;  %v33_v58 = vld [vmem:[%s1687_s0 + $0x68] sm:$0xff]  ;;  %v99_v59 = vld [vmem:[%s1687_s0 + $0x278] sm:$0xff] }
  0x15   :  { %398 = vmatpush.msra.mxu1 %v170_v19  ;;  %871 = vmatpush.msra.mxu3 %v170_v19  ;;  %v34_v60 = vld [vmem:[%s1687_s0 + $0x70] sm:$0xff]  ;;  %v100_v61 = vld [vmem:[%s1687_s0 + $0x280] sm:$0xff]  ;;  %v35_v62 = vld [vmem:[%s1687_s0 + $0x78] sm:$0xff] }
  0x16   :  { %190 = vmatpush.msra.mxu0 %v153_v20  ;;  %856 = vmatpush.msra.mxu2 %v153_v20  ;;  %v101_v63 = vld [vmem:[%s1687_s0 + $0x288] sm:$0xff]  ;;  %v36_v0 = vld [vmem:[%s1687_s0 + $0x80] sm:$0xff]  ;;  %v102_v1 = vld [vmem:[%s1687_s0 + $0x290] sm:$0xff] }
  0x17   :  { %399 = vmatpush.msra.mxu1 %v169_v21  ;;  %872 = vmatpush.msra.mxu3 %v169_v21  ;;  %v37_v2 = vld [vmem:[%s1687_s0 + $0x88] sm:$0xff]  ;;  %v103_v3 = vld [vmem:[%s1687_s0 + $0x298] sm:$0xff]  ;;  %v38_v4 = vld [vmem:[%s1687_s0 + $0x90] sm:$0xff] }
  0x18   :  { %191 = vmatpush.msra.mxu0 %v152_v22  ;;  %857 = vmatpush.msra.mxu2 %v152_v22  ;;  %v104_v5 = vld [vmem:[%s1687_s0 + $0x2a0] sm:$0xff]  ;;  %v39_v6 = vld [vmem:[%s1687_s0 + $0x98] sm:$0xff]  ;;  %v105_v7 = vld [vmem:[%s1687_s0 + $0x2a8] sm:$0xff] }
  0x19   :  { %400 = vmatpush.msra.mxu1 %v168_v23  ;;  %873 = vmatpush.msra.mxu3 %v168_v23  ;;  %v40_v8 = vld [vmem:[%s1687_s0 + $0xa0] sm:$0xff]  ;;  %v106_v9 = vld [vmem:[%s1687_s0 + $0x2b0] sm:$0xff]  ;;  %v41_v10 = vld [vmem:[%s1687_s0 + $0xa8] sm:$0xff] }
  0x1a   :  { %192 = vmatpush.msra.mxu0 %v151_v24  ;;  %858 = vmatpush.msra.mxu2 %v151_v24  ;;  %v107_v11 = vld [vmem:[%s1687_s0 + $0x2b8] sm:$0xff]  ;;  %v42_v12 = vld [vmem:[%s1687_s0 + $0xb0] sm:$0xff]  ;;  %v108_v13 = vld [vmem:[%s1687_s0 + $0x2c0] sm:$0xff] }
  0x1b   :  { %401 = vmatpush.msra.mxu1 %v167_v25  ;;  %874 = vmatpush.msra.mxu3 %v167_v25  ;;  %v43_v14 = vld [vmem:[%s1687_s0 + $0xb8] sm:$0xff]  ;;  %v109_v15 = vld [vmem:[%s1687_s0 + $0x2c8] sm:$0xff]  ;;  %v44_v16 = vld [vmem:[%s1687_s0 + $0xc0] sm:$0xff] }
  0x1c   :  { %193 = vmatpush.msra.mxu0 %v150_v26  ;;  %859 = vmatpush.msra.mxu2 %v150_v26  ;;  %v110_v17 = vld [vmem:[%s1687_s0 + $0x2d0] sm:$0xff]  ;;  %v45_v18 = vld [vmem:[%s1687_s0 + $0xc8] sm:$0xff]  ;;  %v111_v19 = vld [vmem:[%s1687_s0 + $0x2d8] sm:$0xff] }
  0x1d   :  { %402 = vmatpush.msra.mxu1 %v166_v27  ;;  %875 = vmatpush.msra.mxu3 %v166_v27  ;;  %v46_v20 = vld [vmem:[%s1687_s0 + $0xd0] sm:$0xff]  ;;  %v112_v21 = vld [vmem:[%s1687_s0 + $0x2e0] sm:$0xff]  ;;  %v47_v22 = vld [vmem:[%s1687_s0 + $0xd8] sm:$0xff] }
  0x1e   :  { %194 = vmatpush.msra.mxu0 %v149_v28  ;;  %860 = vmatpush.msra.mxu2 %v149_v28  ;;  %v113_v23 = vld [vmem:[%s1687_s0 + $0x2e8] sm:$0xff]  ;;  %v48_v24 = vld [vmem:[%s1687_s0 + $0xe0] sm:$0xff]  ;;  %v114_v25 = vld [vmem:[%s1687_s0 + $0x2f0] sm:$0xff] }
  0x1f   :  { %403 = vmatpush.msra.mxu1 %v165_v29  ;;  %876 = vmatpush.msra.mxu3 %v165_v29  ;;  %v49_v26 = vld [vmem:[%s1687_s0 + $0xe8] sm:$0xff]  ;;  %v115_v27 = vld [vmem:[%s1687_s0 + $0x2f8] sm:$0xff]  ;;  %v50_v28 = vld [vmem:[%s1687_s0 + $0xf0] sm:$0xff] }
  0x20   :  { %195 = vmatpush.msra.mxu0 %v148_v30  ;;  %861 = vmatpush.msra.mxu2 %v148_v30  ;;  %v116_v29 = vld [vmem:[%s1687_s0 + $0x300] sm:$0xff]  ;;  %v51_v30 = vld [vmem:[%s1687_s0 + $0xf8] sm:$0xff] }
  0x21   :  { %404 = vmatpush.msra.mxu1 %v164_v31  ;;  %877 = vmatpush.msra.mxu3 %v164_v31  ;;  %v117_v31 = vld [vmem:[%s1687_s0 + $0x308] sm:$0xff] }
  0x22   :  { %196 = vmatmul.f32.vlgmr.msra.gmra.mxu0 %v20_v32  ;;  %295 = vmatmul.f32.vlgmr.msra.gmra.mxu2 %v86_v33  ;;  %v52_v33 = vld [vmem:[%s1687_s0 + $0x100] sm:$0xff] }
  0x23   :  { %405 = vmatmul.f32.vlgmr.msra.gmra.mxu1 %v21_v34  ;;  %504 = vmatmul.f32.vlgmr.msra.gmra.mxu3 %v87_v35  ;;  %v118_v34 = vld [vmem:[%s1687_s0 + $0x310] sm:$0xff] }
  0x2a   :  { %199 = vmatmul.f32.gmra.mxu0 %v22_v36  ;;  %298 = vmatmul.f32.gmra.mxu2 %v88_v37  ;;  %v53_v36 = vld [vmem:[%s1687_s0 + $0x108] sm:$0xff]  ;;  %v119_v37 = vld [vmem:[%s1687_s0 + $0x318] sm:$0xff] }
  0x2b   :  { %408 = vmatmul.f32.gmra.mxu1 %v23_v38  ;;  %507 = vmatmul.f32.gmra.mxu3 %v89_v39 }
  0x32   :  { %202 = vmatmul.f32.gmra.mxu0 %v24_v40  ;;  %301 = vmatmul.f32.gmra.mxu2 %v90_v41 }
  0x33   :  { %411 = vmatmul.f32.gmra.mxu1 %v25_v42  ;;  %510 = vmatmul.f32.gmra.mxu3 %v91_v43  ;;  %v54_v42 = vld [vmem:[%s1687_s0 + $0x110] sm:$0xff]  ;;  %v120_v43 = vld [vmem:[%s1687_s0 + $0x320] sm:$0xff] }
  0x3a   :  { %205 = vmatmul.f32.gmra.mxu0 %v26_v44  ;;  %304 = vmatmul.f32.gmra.mxu2 %v92_v45  ;;  %v55_v45 = vld [vmem:[%s1687_s0 + $0x118] sm:$0xff] }
  0x3b   :  { %414 = vmatmul.f32.gmra.mxu1 %v27_v46  ;;  %513 = vmatmul.f32.gmra.mxu3 %v93_v47  ;;  %v121_v46 = vld [vmem:[%s1687_s0 + $0x328] sm:$0xff] }
  0x42   :  { %208 = vmatmul.f32.gmra.mxu0 %v28_v48  ;;  %307 = vmatmul.f32.gmra.mxu2 %v94_v49 }
  0x43   :  { %417 = vmatmul.f32.gmra.mxu1 %v29_v50  ;;  %516 = vmatmul.f32.gmra.mxu3 %v95_v51  ;;  %v56_v51 = vld [vmem:[%s1687_s0 + $0x120] sm:$0xff] }
  0x4a   :  { %211 = vmatmul.f32.gmra.mxu0 %v30_v52  ;;  %310 = vmatmul.f32.gmra.mxu2 %v96_v53  ;;  %v122_v52 = vld [vmem:[%s1687_s0 + $0x330] sm:$0xff] }
  0x4b   :  { %420 = vmatmul.f32.gmra.mxu1 %v31_v54  ;;  %519 = vmatmul.f32.gmra.mxu3 %v97_v55  ;;  %v57_v54 = vld [vmem:[%s1687_s0 + $0x128] sm:$0xff]  ;;  %v123_v55 = vld [vmem:[%s1687_s0 + $0x338] sm:$0xff] }
  0x52   :  { %214 = vmatmul.f32.gmra.mxu0 %v32_v56  ;;  %313 = vmatmul.f32.gmra.mxu2 %v98_v57 }
  0x53   :  { %423 = vmatmul.f32.gmra.mxu1 %v33_v58  ;;  %522 = vmatmul.f32.gmra.mxu3 %v99_v59 }
  0x5a   :  { %217 = vmatmul.f32.gmra.mxu0 %v34_v60  ;;  %316 = vmatmul.f32.gmra.mxu2 %v100_v61  ;;  %v58_v60 = vld [vmem:[%s1687_s0 + $0x130] sm:$0xff]  ;;  %v124_v61 = vld [vmem:[%s1687_s0 + $0x340] sm:$0xff] }
  0x5b   :  { %426 = vmatmul.f32.gmra.mxu1 %v35_v62  ;;  %525 = vmatmul.f32.gmra.mxu3 %v101_v63  ;;  %v59_v63 = vld [vmem:[%s1687_s0 + $0x138] sm:$0xff] }
  0x62   :  { %220 = vmatmul.f32.gmra.mxu0 %v36_v0  ;;  %319 = vmatmul.f32.gmra.mxu2 %v102_v1  ;;  %v125_v0 = vld [vmem:[%s1687_s0 + $0x348] sm:$0xff] }
  0x63   :  { %429 = vmatmul.f32.gmra.mxu1 %v37_v2  ;;  %528 = vmatmul.f32.gmra.mxu3 %v103_v3 }
  0x6a   :  { %223 = vmatmul.f32.gmra.mxu0 %v38_v4  ;;  %322 = vmatmul.f32.gmra.mxu2 %v104_v5  ;;  %v60_v5 = vld [vmem:[%s1687_s0 + $0x140] sm:$0xff] }
  0x6b   :  { %432 = vmatmul.f32.gmra.mxu1 %v39_v6  ;;  %531 = vmatmul.f32.gmra.mxu3 %v105_v7  ;;  %v126_v6 = vld [vmem:[%s1687_s0 + $0x350] sm:$0xff] }
  0x72   :  { %226 = vmatmul.f32.gmra.mxu0 %v40_v8  ;;  %325 = vmatmul.f32.gmra.mxu2 %v106_v9  ;;  %v61_v8 = vld [vmem:[%s1687_s0 + $0x148] sm:$0xff]  ;;  %v127_v9 = vld [vmem:[%s1687_s0 + $0x358] sm:$0xff] }
  0x73   :  { %435 = vmatmul.f32.gmra.mxu1 %v41_v10  ;;  %534 = vmatmul.f32.gmra.mxu3 %v107_v11 }
  0x7a   :  { %229 = vmatmul.f32.gmra.mxu0 %v42_v12  ;;  %328 = vmatmul.f32.gmra.mxu2 %v108_v13 }
  0x7b   :  { %438 = vmatmul.f32.gmra.mxu1 %v43_v14  ;;  %537 = vmatmul.f32.gmra.mxu3 %v109_v15  ;;  %v62_v14 = vld [vmem:[%s1687_s0 + $0x150] sm:$0xff]  ;;  %v128_v15 = vld [vmem:[%s1687_s0 + $0x360] sm:$0xff] }
  0x82   :  { %232 = vmatmul.f32.gmra.mxu0 %v44_v16  ;;  %331 = vmatmul.f32.gmra.mxu2 %v110_v17  ;;  %v63_v17 = vld [vmem:[%s1687_s0 + $0x158] sm:$0xff] }
  0x83   :  { %441 = vmatmul.f32.gmra.mxu1 %v45_v18  ;;  %540 = vmatmul.f32.gmra.mxu3 %v111_v19  ;;  %v129_v18 = vld [vmem:[%s1687_s0 + $0x368] sm:$0xff] }
  0x8a   :  { %235 = vmatmul.f32.gmra.mxu0 %v46_v20  ;;  %334 = vmatmul.f32.gmra.mxu2 %v112_v21 }
  0x8b   :  { %444 = vmatmul.f32.gmra.mxu1 %v47_v22  ;;  %543 = vmatmul.f32.gmra.mxu3 %v113_v23  ;;  %v64_v23 = vld [vmem:[%s1687_s0 + $0x160] sm:$0xff] }
  0x92   :  { %238 = vmatmul.f32.gmra.mxu0 %v48_v24  ;;  %337 = vmatmul.f32.gmra.mxu2 %v114_v25  ;;  %v130_v24 = vld [vmem:[%s1687_s0 + $0x370] sm:$0xff] }
  0x93   :  { %447 = vmatmul.f32.gmra.mxu1 %v49_v26  ;;  %546 = vmatmul.f32.gmra.mxu3 %v115_v27  ;;  %v65_v26 = vld [vmem:[%s1687_s0 + $0x168] sm:$0xff]  ;;  %v131_v27 = vld [vmem:[%s1687_s0 + $0x378] sm:$0xff] }
  0x9a   :  { %241 = vmatmul.f32.gmra.mxu0 %v50_v28  ;;  %340 = vmatmul.f32.gmra.mxu2 %v116_v29 }
  0x9b   :  { %450 = vmatmul.f32.gmra.mxu1 %v51_v30  ;;  %549 = vmatmul.f32.gmra.mxu3 %v117_v31 }
  0x9f   :  { %v1212_v32 = vpop.f32.mrf.mxu0 }
  0xa0   :  { %v1220_v35 = vpop.f32.mrf.mxu1 }
  0xa2   :  { %244 = vmatmul.f32.gmra.mxu0 %v52_v33  ;;  %343 = vmatmul.f32.gmra.mxu2 %v118_v34  ;;  %v66_v33 = vld [vmem:[%s1687_s0 + $0x170] sm:$0xff]  ;;  %v132_v34 = vld [vmem:[%s1687_s0 + $0x380] sm:$0xff] }
  0xa3   :  { %453 = vmatmul.f32.gmra.mxu1 %v53_v36  ;;  %552 = vmatmul.f32.gmra.mxu3 %v119_v37  ;;  %v67_v37 = vld [vmem:[%s1687_s0 + $0x178] sm:$0xff] }
  0xa5   :  { %v296_v38 = vpop.f32.mrf.mxu2 }
  0xa6   :  { %v505_v39 = vpop.f32.mrf.mxu3 }
  0xa7   :  { %v1228_v40 = vadd.f32 %v505_v39, %v296_v38  ;;  %v1230_v41 = vpop.f32.mrf.mxu0  ;;  %v133_v38 = vld [vmem:[%s1687_s0 + $0x388] sm:$0xff] }
  0xa8   :  { %v1238_v44 = vpop.f32.mrf.mxu1 }
  0xaa   :  { %247 = vmatmul.f32.gmra.mxu0 %v54_v42  ;;  %346 = vmatmul.f32.gmra.mxu2 %v120_v43 }
  0xab   :  { %456 = vmatmul.f32.gmra.mxu1 %v55_v45  ;;  %555 = vmatmul.f32.gmra.mxu3 %v121_v46  ;;  %v68_v45 = vld [vmem:[%s1687_s0 + $0x180] sm:$0xff]  ;;  %v134_v46 = vld [vmem:[%s1687_s0 + $0x390] sm:$0xff] }
  0xad   :  { %v299_v47 = vpop.f32.mrf.mxu2 }
  0xae   :  { %v508_v48 = vpop.f32.mrf.mxu3 }
  0xaf   :  { %v1246_v49 = vadd.f32 %v508_v48, %v299_v47  ;;  %v1248_v50 = vpop.f32.mrf.mxu0  ;;  %v69_v48 = vld [vmem:[%s1687_s0 + $0x188] sm:$0xff] }
  0xb0   :  { %v1256_v53 = vpop.f32.mrf.mxu1 }
  0xb2   :  { %250 = vmatmul.f32.gmra.mxu0 %v56_v51  ;;  %349 = vmatmul.f32.gmra.mxu2 %v122_v52  ;;  %v135_v51 = vld [vmem:[%s1687_s0 + $0x398] sm:$0xff] }
  0xb3   :  { %459 = vmatmul.f32.gmra.mxu1 %v57_v54  ;;  %558 = vmatmul.f32.gmra.mxu3 %v123_v55 }
  0xb5   :  { %v302_v56 = vpop.f32.mrf.mxu2 }
  0xb6   :  { %v511_v57 = vpop.f32.mrf.mxu3 }
  0xb7   :  { %v1264_v58 = vadd.f32 %v511_v57, %v302_v56  ;;  %v1266_v59 = vpop.f32.mrf.mxu0  ;;  %v70_v57 = vld [vmem:[%s1687_s0 + $0x190] sm:$0xff] }
  0xb8   :  { %v1274_v62 = vpop.f32.mrf.mxu1 }
  0xba   :  { %253 = vmatmul.f32.gmra.mxu0 %v58_v60  ;;  %352 = vmatmul.f32.gmra.mxu2 %v124_v61  ;;  %v136_v60 = vld [vmem:[%s1687_s0 + $0x3a0] sm:$0xff] }
  0xbb   :  { %462 = vmatmul.f32.gmra.mxu1 %v59_v63  ;;  %561 = vmatmul.f32.gmra.mxu3 %v125_v0  ;;  %v71_v63 = vld [vmem:[%s1687_s0 + $0x198] sm:$0xff]  ;;  %v137_v0 = vld [vmem:[%s1687_s0 + $0x3a8] sm:$0xff] }
  0xbd   :  { %v305_v1 = vpop.f32.mrf.mxu2 }
  0xbe   :  { %v514_v2 = vpop.f32.mrf.mxu3 }
  0xbf   :  { %v1282_v3 = vadd.f32 %v514_v2, %v305_v1  ;;  %v1284_v4 = vpop.f32.mrf.mxu0 }
  0xc0   :  { %v1292_v7 = vpop.f32.mrf.mxu1 }
  0xc2   :  { %256 = vmatmul.f32.gmra.mxu0 %v60_v5  ;;  %355 = vmatmul.f32.gmra.mxu2 %v126_v6 }
  0xc3   :  { %465 = vmatmul.f32.gmra.mxu1 %v61_v8  ;;  %564 = vmatmul.f32.gmra.mxu3 %v127_v9  ;;  %v72_v9 = vld [vmem:[%s1687_s0 + $0x1a0] sm:$0xff] }
  0xc5   :  { %v308_v10 = vpop.f32.mrf.mxu2 }
  0xc6   :  { %v517_v11 = vpop.f32.mrf.mxu3 }
  0xc7   :  { %v1300_v12 = vadd.f32 %v517_v11, %v308_v10  ;;  %v1302_v13 = vpop.f32.mrf.mxu0  ;;  %v138_v10 = vld [vmem:[%s1687_s0 + $0x3b0] sm:$0xff] }
  0xc8   :  { %v1310_v16 = vpop.f32.mrf.mxu1 }
  0xca   :  { %259 = vmatmul.f32.gmra.mxu0 %v62_v14  ;;  %358 = vmatmul.f32.gmra.mxu2 %v128_v15  ;;  %v73_v14 = vld [vmem:[%s1687_s0 + $0x1a8] sm:$0xff]  ;;  %v139_v15 = vld [vmem:[%s1687_s0 + $0x3b8] sm:$0xff] }
  0xcb   :  { %468 = vmatmul.f32.gmra.mxu1 %v63_v17  ;;  %567 = vmatmul.f32.gmra.mxu3 %v129_v18 }
  0xcd   :  { %v311_v19 = vpop.f32.mrf.mxu2 }
  0xce   :  { %v520_v20 = vpop.f32.mrf.mxu3 }
  0xcf   :  { %v1318_v21 = vadd.f32 %v520_v20, %v311_v19  ;;  %v1320_v22 = vpop.f32.mrf.mxu0 }
  0xd0   :  { %v1328_v25 = vpop.f32.mrf.mxu1 }
  0xd2   :  { %262 = vmatmul.f32.gmra.mxu0 %v64_v23  ;;  %361 = vmatmul.f32.gmra.mxu2 %v130_v24  ;;  %v74_v24 = vld [vmem:[%s1687_s0 + $0x1b0] sm:$0xff] }
  0xd3   :  { %471 = vmatmul.f32.gmra.mxu1 %v65_v26  ;;  %570 = vmatmul.f32.gmra.mxu3 %v131_v27  ;;  %v140_v26 = vld [vmem:[%s1687_s0 + $0x3c0] sm:$0xff] }
  0xd5   :  { %v314_v28 = vpop.f32.mrf.mxu2 }
  0xd6   :  { %v523_v29 = vpop.f32.mrf.mxu3 }
  0xd7   :  { %v1336_v30 = vadd.f32 %v523_v29, %v314_v28  ;;  %v1338_v31 = vpop.f32.mrf.mxu0  ;;  %v75_v28 = vld [vmem:[%s1687_s0 + $0x1b8] sm:$0xff]  ;;  %v141_v29 = vld [vmem:[%s1687_s0 + $0x3c8] sm:$0xff] }
  0xd8   :  { %v1346_v36 = vpop.f32.mrf.mxu1 }
  0xda   :  { %265 = vmatmul.f32.gmra.mxu0 %v66_v33  ;;  %364 = vmatmul.f32.gmra.mxu2 %v132_v34 }
  0xdb   :  { %474 = vmatmul.f32.gmra.mxu1 %v67_v37  ;;  %573 = vmatmul.f32.gmra.mxu3 %v133_v38 }
  0xdd   :  { %v1354_v39 = vpop.f32.mrf.mxu2 }
  0xde   :  { %v1356_v42 = vpop.f32.mrf.mxu3 }
  0xdf   :  { %v1358_v43 = vpop.f32.mrf.mxu0 }
  0xe0   :  { %v1366_v47 = vpop.f32.mrf.mxu1 }
  0xe2   :  { %268 = vmatmul.f32.gmra.mxu0 %v68_v45  ;;  %367 = vmatmul.f32.gmra.mxu2 %v134_v46  ;;  %v76_v46 = vld [vmem:[%s1687_s0 + $0x1c0] sm:$0xff] }
  0xe3   :  { %477 = vmatmul.f32.gmra.mxu1 %v69_v48  ;;  %576 = vmatmul.f32.gmra.mxu3 %v135_v51  ;;  %v142_v48 = vld [vmem:[%s1687_s0 + $0x3d0] sm:$0xff] }
  0xe5   :  { %v320_v52 = vpop.f32.mrf.mxu2 }
  0xe6   :  { %v529_v54 = vpop.f32.mrf.mxu3 }
  0xe7   :  { %v1374_v55 = vadd.f32 %v529_v54, %v320_v52  ;;  %v224_v56 = vpop.f32.mrf.mxu0  ;;  %v77_v52 = vld [vmem:[%s1687_s0 + $0x1c8] sm:$0xff]  ;;  %v143_v54 = vld [vmem:[%s1687_s0 + $0x3d8] sm:$0xff] }
  0xe8   :  { %v433_v61 = vpop.f32.mrf.mxu1 }
  0xe9   :  { %v1388_v1 = vadd.f32 %v433_v61, %v224_v56 }
  0xea   :  { %271 = vmatmul.f32.gmra.mxu0 %v70_v57  ;;  %370 = vmatmul.f32.gmra.mxu2 %v136_v60  ;;  %v779_v57 = vld [vmem:[%s1689_s3 + $0x78] sm:$0xff] }
  0xeb   :  { %480 = vmatmul.f32.gmra.mxu1 %v71_v63  ;;  %579 = vmatmul.f32.gmra.mxu3 %v137_v0 }
  0xec   :  { %800 = vmatpush.msrb.mxu2 %v779_v57  ;;  %v83_v57 = vld [vmem:[%s1687_s0 + $0x1f8] sm:$0xff] }
  0xed   :  { %v323_v2 = vpop.f32.mrf.mxu2 }
  0xee   :  { %v532_v5 = vpop.f32.mrf.mxu3 }
  0xef   :  { %v1390_v6 = vadd.f32 %v532_v5, %v323_v2  ;;  %v227_v8 = vpop.f32.mrf.mxu0  ;;  %v78_v2 = vld [vmem:[%s1687_s0 + $0x1d0] sm:$0xff]  ;;  %v144_v5 = vld [vmem:[%s1687_s0 + $0x3e0] sm:$0xff] }
  0xf0   :  { %v436_v11 = vpop.f32.mrf.mxu1 }
  0xf1   :  { %v1404_v17 = vadd.f32 %v436_v11, %v227_v8 }
  0xf2   :  { %274 = vmatmul.f32.gmra.mxu0 %v72_v9  ;;  %373 = vmatmul.f32.gmra.mxu2 %v138_v10  ;;  %v79_v9 = vld [vmem:[%s1687_s0 + $0x1d8] sm:$0xff]  ;;  %v145_v10 = vld [vmem:[%s1687_s0 + $0x3e8] sm:$0xff] }
  0xf3   :  { %483 = vmatmul.f32.gmra.mxu1 %v73_v14  ;;  %582 = vmatmul.f32.gmra.mxu3 %v139_v15  ;;  %v795_v14 = vld [vmem:[%s1689_s3 + $0xf8] sm:$0xff] }
  0xf4   :  { %820 = vmatpush.msrb.mxu3 %v795_v14  ;;  %v85_v14 = vld [vmem:[%s1687_s0 + $0x208] sm:$0xff] }
  0xf5   :  { %v326_v18 = vpop.f32.mrf.mxu2 }
  0xf6   :  { %v535_v19 = vpop.f32.mrf.mxu3 }
  0xf7   :  { %v1406_v20 = vadd.f32 %v535_v19, %v326_v18  ;;  %v230_v23 = vpop.f32.mrf.mxu0 }
  0xf8   :  { %v439_v27 = vpop.f32.mrf.mxu1 }
  0xf9   :  { %v1420_v33 = vadd.f32 %v439_v27, %v230_v23 }
  0xfa   :  { %277 = vmatmul.f32.gmra.mxu0 %v74_v24  ;;  %376 = vmatmul.f32.gmra.mxu2 %v140_v26  ;;  %v80_v24 = vld [vmem:[%s1687_s0 + $0x1e0] sm:$0xff]  ;;  %v146_v26 = vld [vmem:[%s1687_s0 + $0x3f0] sm:$0xff] }
  0xfb   :  { %486 = vmatmul.f32.gmra.mxu1 %v75_v28  ;;  %585 = vmatmul.f32.gmra.mxu3 %v141_v29  ;;  %v81_v28 = vld [vmem:[%s1687_s0 + $0x1e8] sm:$0xff]  ;;  %v147_v29 = vld [vmem:[%s1687_s0 + $0x3f8] sm:$0xff] }
  0xfd   :  { %v329_v34 = vpop.f32.mrf.mxu2 }
  0xfe   :  { %v538_v37 = vpop.f32.mrf.mxu3 }
  0xff   :  { %v1422_v38 = vadd.f32 %v538_v37, %v329_v34  ;;  %v233_v45 = vpop.f32.mrf.mxu0 }
 0x100   :  { %v442_v51 = vpop.f32.mrf.mxu1 }
 0x101   :  { %v1436_v56 = vadd.f32 %v442_v51, %v233_v45  ;;  %v778_v45 = vld [vmem:[%s1689_s3 + $0x70] sm:$0xff] }
 0x102   :  { %280 = vmatmul.f32.gmra.mxu0 %v76_v46  ;;  %379 = vmatmul.f32.gmra.mxu2 %v142_v48 }
 0x103   :  { %489 = vmatmul.f32.gmra.mxu1 %v77_v52  ;;  %588 = vmatmul.f32.gmra.mxu3 %v143_v54  ;;  %v82_v52 = vld [vmem:[%s1687_s0 + $0x1f0] sm:$0xff] }
 0x104   :  { %801 = vmatpush.msrb.mxu2 %v778_v45 }
 0x105   :  { %v332_v60 = vpop.f32.mrf.mxu2 }
 0x106   :  { %v541_v61 = vpop.f32.mrf.mxu3 }
 0x107   :  { %v1441_v63 = vadd.f32 %v541_v61, %v332_v60  ;;  %v236_v0 = vpop.f32.mrf.mxu0  ;;  %v794_v61 = vld [vmem:[%s1689_s3 + $0xf0] sm:$0xff] }
 0x108   :  { %v445_v8 = vpop.f32.mrf.mxu1  ;;  %821 = vmatpush.msrb.mxu3 %v794_v61 }
 0x109   :  { %v1455_v11 = vadd.f32 %v445_v8, %v236_v0 }
 0x10a   :  { %283 = vmatmul.f32.gmra.mxu0 %v78_v2  ;;  %382 = vmatmul.f32.gmra.mxu2 %v144_v5 }
 0x10b   :  { %492 = vmatmul.f32.gmra.mxu1 %v79_v9  ;;  %591 = vmatmul.f32.gmra.mxu3 %v145_v10  ;;  %v84_v9 = vld [vmem:[%s1687_s0 + $0x200] sm:$0xff] }
 0x10d   :  { %v335_v15 = vpop.f32.mrf.mxu2 }
 0x10e   :  { %v544_v18 = vpop.f32.mrf.mxu3 }
 0x10f   :  { %v1460_v19 = vadd.f32 %v544_v18, %v335_v15  ;;  %v239_v23 = vpop.f32.mrf.mxu0  ;;  %v777_v18 = vld [vmem:[%s1689_s3 + $0x68] sm:$0xff] }
 0x110   :  { %v448_v27 = vpop.f32.mrf.mxu1  ;;  %802 = vmatpush.msrb.mxu2 %v777_v18 }
 0x111   :  { %v1474_v34 = vadd.f32 %v448_v27, %v239_v23  ;;  %v793_v23 = vld [vmem:[%s1689_s3 + $0xe8] sm:$0xff] }
 0x112   :  { %286 = vmatmul.f32.gmra.mxu0 %v80_v24  ;;  %385 = vmatmul.f32.gmra.mxu2 %v146_v26 }
 0x113   :  { %495 = vmatmul.f32.gmra.mxu1 %v81_v28  ;;  %594 = vmatmul.f32.gmra.mxu3 %v147_v29 }
 0x114   :  { %822 = vmatpush.msrb.mxu3 %v793_v23 }
 0x115   :  { %v338_v37 = vpop.f32.mrf.mxu2 }
 0x116   :  { %v547_v46 = vpop.f32.mrf.mxu3 }
 0x117   :  { %v1479_v48 = vadd.f32 %v547_v46, %v338_v37  ;;  %v242_v51 = vpop.f32.mrf.mxu0  ;;  %v410_v37 = vadd.f32 %v1238_v44, %v1230_v41  ;;  %v413_v41 = vadd.f32 %v1256_v53, %v1248_v50 }
 0x118   :  { %v451_v54 = vpop.f32.mrf.mxu1 }
 0x119   :  { %v1487_v60 = vadd.f32 %v451_v54, %v242_v51 }
 0x11a   :  { %289 = vmatmul.f32.gmra.mxu0 %v82_v52  ;;  %v1514_v52 = vld [vmem:[%s1688_s2] ss:$0 sm:$0xff] }
 0x11b   :  { %498 = vmatmul.f32.gmra.mxu1 %v83_v57 }
 0x11d   :  { %v341_v0 = vpop.f32.mrf.mxu2 }
 0x11e   :  { %v550_v2 = vpop.f32.mrf.mxu3 }
 0x11f   :  { %v1492_v5 = vadd.f32 %v550_v2, %v341_v0  ;;  %v245_v8 = vpop.f32.mrf.mxu0 }
 0x120   :  { %v454_v10 = vpop.f32.mrf.mxu1 }
 0x121   :  { %v1500_v15 = vadd.f32 %v454_v10, %v245_v8 }
 0x122   :  { %292 = vmatmul.f32.gmra.mxu0 %v84_v9 }
 0x123   :  { %501 = vmatmul.f32.gmra.mxu1 %v85_v14 }
 0x125   :  { %v344_v24 = vpop.f32.mrf.mxu2 }
 0x126   :  { %v553_v26 = vpop.f32.mrf.mxu3 }
 0x127   :  { %v554_v27 = vadd.f32 %v553_v26, %v344_v24  ;;  %v248_v28 = vpop.f32.mrf.mxu0  ;;  %v776_v24 = vld [vmem:[%s1689_s3 + $0x60] sm:$0xff] }
 0x128   :  { %v457_v29 = vpop.f32.mrf.mxu1  ;;  %v792_v26 = vld [vmem:[%s1689_s3 + $0xe0] sm:$0xff]  ;;  %803 = vmatpush.msrb.mxu2 %v776_v24 }
 0x129   :  { %v458_v45 = vadd.f32 %v457_v29, %v248_v28  ;;  %v615_v46 = vmax.f32 %v1228_v40, %v554_v27  ;;  %823 = vmatpush.msrb.mxu3 %v792_v26  ;;  %v416_v29 = vadd.f32 %v1274_v62, %v1266_v59  ;;  %v422_v26 = vadd.f32 %v1310_v16, %v1302_v13 }
 0x12b   :  { %v599_v51 = vmax.f32 %v410_v37, %v458_v45 }
 0x12d   :  { %v347_v54 = vpop.f32.mrf.mxu2  ;;  %v631_v57 = vmax.f32 %v599_v51, %v615_v46 }
 0x12e   :  { %v556_v61 = vpop.f32.mrf.mxu3 }
 0x12f   :  { %v557_v0 = vadd.f32 %v556_v61, %v347_v54  ;;  %v251_v2 = vpop.f32.mrf.mxu0  ;;  %v651_v8 = vadd.f32 %v1514_v52, %v631_v57 }
 0x130   :  { %v460_v9 = vpop.f32.mrf.mxu1 }
 0x131   :  { %v461_v44 = vadd.f32 %v460_v9, %v251_v2  ;;  %v667_v10 = vmax.f32 %v651_v8, 0.0  ;;  %v616_v40 = vmax.f32 %v1246_v49, %v557_v0 }
 0x133   :  { %v600_v14 = vmax.f32 %v413_v41, %v461_v44  ;;  %685 = vrot.lane.b32.xlu0 %v667_v10, %s887_s15  ;;  %v419_v41 = vadd.f32 %v1292_v7, %v1284_v4 }
 0x135   :  { %v632_v18 = vmax.f32 %v600_v14, %v616_v40  ;;  %v350_v23 = vpop.f32.mrf.mxu2  ;;  %v775_v14 = vld [vmem:[%s1689_s3 + $0x58] sm:$0xff] }
 0x136   :  { %v559_v27 = vpop.f32.mrf.mxu3  ;;  %804 = vmatpush.msrb.mxu2 %v775_v14 }
 0x137   :  { %v560_v50 = vadd.f32 %v559_v27, %v350_v23  ;;  %v254_v53 = vpop.f32.mrf.mxu0  ;;  %v652_v49 = vadd.f32 %v1514_v52, %v632_v18  ;;  %v791_v18 = vld [vmem:[%s1689_s3 + $0xd8] sm:$0xff] }
 0x138   :  { %v463_v28 = vpop.f32.mrf.mxu1  ;;  %824 = vmatpush.msrb.mxu3 %v791_v18 }
 0x139   :  { %v464_v37 = vadd.f32 %v463_v28, %v254_v53  ;;  %v668_v45 = vmax.f32 %v652_v49, 0.0  ;;  %v617_v46 = vmax.f32 %v1264_v58, %v560_v50 }
 0x13b   :  { %v601_v51 = vmax.f32 %v416_v29, %v464_v37  ;;  %691 = vrot.lane.b32.xlu0 %v668_v45, %s888_s19 }
 0x13d   :  { %v353_v54 = vpop.f32.mrf.mxu2  ;;  %v633_v57 = vmax.f32 %v601_v51, %v617_v46 }
 0x13e   :  { %v562_v61 = vpop.f32.mrf.mxu3 }
 0x13f   :  { %v563_v0 = vadd.f32 %v562_v61, %v353_v54  ;;  %v257_v2 = vpop.f32.mrf.mxu0  ;;  %v653_v8 = vadd.f32 %v1514_v52, %v633_v57  ;;  %v425_v57 = vadd.f32 %v1328_v25, %v1320_v22 }
 0x140   :  { %v466_v9 = vpop.f32.mrf.mxu1 }
 0x141   :  { %v467_v59 = vadd.f32 %v466_v9, %v257_v2  ;;  %v669_v62 = vmax.f32 %v653_v8, 0.0  ;;  %v618_v44 = vmax.f32 %v1282_v3, %v563_v0  ;;  %v774_v8 = vld [vmem:[%s1689_s3 + $0x50] sm:$0xff] }
 0x142   :  { %v790_v9 = vld [vmem:[%s1689_s3 + $0xd0] sm:$0xff]  ;;  %805 = vmatpush.msrb.mxu2 %v774_v8 }
 0x143   :  { %v602_v58 = vmax.f32 %v419_v41, %v467_v59  ;;  %697 = vrot.lane.b32.xlu1 %v669_v62, %s889_s20  ;;  %825 = vmatpush.msrb.mxu3 %v790_v9  ;;  %v428_v62 = vadd.f32 %v1346_v36, %v1338_v31  ;;  %v431_v31 = vadd.f32 %v1366_v47, %v1358_v43 }
 0x145   :  { %v356_v10 = vpop.f32.mrf.mxu2  ;;  %v634_v40 = vmax.f32 %v602_v58, %v618_v44 }
 0x146   :  { %v565_v23 = vpop.f32.mrf.mxu3 }
 0x147   :  { %v566_v4 = vadd.f32 %v565_v23, %v356_v10  ;;  %v260_v7 = vpop.f32.mrf.mxu0  ;;  %v654_v3 = vadd.f32 %v1514_v52, %v634_v40 }
 0x148   :  { %v469_v24 = vpop.f32.mrf.mxu1 }
 0x149   :  { %v470_v27 = vadd.f32 %v469_v24, %v260_v7  ;;  %v670_v50 = vmax.f32 %v654_v3, 0.0  ;;  %v619_v53 = vmax.f32 %v1300_v12, %v566_v4 }
 0x14b   :  { %v603_v49 = vmax.f32 %v422_v26, %v470_v27  ;;  %703 = vrot.lane.b32.xlu2 %v670_v50, %s890_s25  ;;  %v527_v26 = vadd.f32 %v1356_v42, %v1354_v39  ;;  %v789_v39 = vld [vmem:[%s1689_s3 + $0xc8] sm:$0xff] }
 0x14c   :  { %826 = vmatpush.msrb.mxu3 %v789_v39 }
 0x14d   :  { %v635_v28 = vmax.f32 %v603_v49, %v619_v53  ;;  %v359_v29 = vpop.f32.mrf.mxu2 }
 0x14e   :  { %v568_v37 = vpop.f32.mrf.mxu3 }
 0x14f   :  { %v569_v45 = vadd.f32 %v568_v37, %v359_v29  ;;  %v263_v46 = vpop.f32.mrf.mxu0  ;;  %v655_v51 = vadd.f32 %v1514_v52, %v635_v28  ;;  %v773_v28 = vld [vmem:[%s1689_s3 + $0x48] sm:$0xff] }
 0x150   :  { %v472_v54 = vpop.f32.mrf.mxu1  ;;  %806 = vmatpush.msrb.mxu2 %v773_v28 }
 0x151   :  { %v473_v13 = vadd.f32 %v472_v54, %v263_v46  ;;  %v671_v16 = vmax.f32 %v655_v51, 0.0  ;;  %v620_v61 = vmax.f32 %v1318_v21, %v569_v45 }
 0x153   :  { %v604_v12 = vmax.f32 %v425_v57, %v473_v13  ;;  %709 = vrot.lane.b32.xlu0 %v671_v16, %s891_s26 }
 0x155   :  { %v636_v0 = vmax.f32 %v604_v12, %v620_v61  ;;  %v362_v2 = vpop.f32.mrf.mxu2 }
 0x156   :  { %v571_v41 = vpop.f32.mrf.mxu3 }
 0x157   :  { %v572_v22 = vadd.f32 %v571_v41, %v362_v2  ;;  %v266_v25 = vpop.f32.mrf.mxu0  ;;  %v656_v21 = vadd.f32 %v1514_v52, %v636_v0 }
 0x158   :  { %v475_v59 = vpop.f32.mrf.mxu1 }
 0x159   :  { %v476_v44 = vadd.f32 %v475_v59, %v266_v25  ;;  %v672_v58 = vmax.f32 %v656_v21, 0.0  ;;  %v621_v10 = vmax.f32 %v1336_v30, %v572_v22  ;;  %v772_v25 = vld [vmem:[%s1689_s3 + $0x40] sm:$0xff] }
 0x15a   :  { %v788_v21 = vld [vmem:[%s1689_s3 + $0xc0] sm:$0xff]  ;;  %807 = vmatpush.msrb.mxu2 %v772_v25 }
 0x15b   :  { %v605_v40 = vmax.f32 %v428_v62, %v476_v44  ;;  %715 = vrot.lane.b32.xlu2 %v672_v58, %s892_s6  ;;  %827 = vmatpush.msrb.mxu3 %v788_v21 }
 0x15d   :  { %v637_v14 = vmax.f32 %v605_v40, %v621_v10  ;;  %v365_v18 = vpop.f32.mrf.mxu2 }
 0x15e   :  { %v574_v23 = vpop.f32.mrf.mxu3 }
 0x15f   :  { %v575_v4 = vadd.f32 %v574_v23, %v365_v18  ;;  %v269_v7 = vpop.f32.mrf.mxu0  ;;  %v657_v3 = vadd.f32 %v1514_v52, %v637_v14 }
 0x160   :  { %v478_v24 = vpop.f32.mrf.mxu1 }
 0x161   :  { %v479_v36 = vadd.f32 %v478_v24, %v269_v7  ;;  %v673_v30 = vmax.f32 %v657_v3, 0.0  ;;  %v622_v27 = vmax.f32 %v527_v26, %v575_v4 }
 0x163   :  { %v606_v50 = vmax.f32 %v431_v31, %v479_v36  ;;  %721 = vrot.lane.b32.xlu1 %v673_v30, %s893_s7 }
 0x165   :  { %v638_v53 = vmax.f32 %v606_v50, %v622_v27  ;;  %v368_v49 = vpop.f32.mrf.mxu2  ;;  %v771_v50 = vld [vmem:[%s1689_s3 + $0x38] sm:$0xff] }
 0x166   :  { %v577_v42 = vpop.f32.mrf.mxu3  ;;  %808 = vmatpush.msrb.mxu2 %v771_v50 }
 0x167   :  { %v578_v43 = vadd.f32 %v577_v42, %v368_v49  ;;  %v272_v47 = vpop.f32.mrf.mxu0  ;;  %v658_v29 = vadd.f32 %v1514_v52, %v638_v53  ;;  %v787_v53 = vld [vmem:[%s1689_s3 + $0xb8] sm:$0xff] }
 0x168   :  { %v481_v37 = vpop.f32.mrf.mxu1  ;;  %828 = vmatpush.msrb.mxu3 %v787_v53  ;;  %v781_v53 = vld [vmem:[%s1689_s3 + $0x88] sm:$0xff] }
 0x169   :  { %v482_v45 = vadd.f32 %v481_v37, %v272_v47  ;;  %v674_v46 = vmax.f32 %v658_v29, 0.0  ;;  %v623_v51 = vmax.f32 %v1374_v55, %v578_v43 }
 0x16b   :  { %v607_v54 = vmax.f32 %v1388_v1, %v482_v45  ;;  %726 = vst.msk [vmem:[#allocation2 + $0x8] sm:$0xff] %vm682_vm0, %v674_v46 }
 0x16d   :  { %v639_v57 = vmax.f32 %v607_v54, %v623_v51  ;;  %v371_v13 = vpop.f32.mrf.mxu2  ;;  %v770_v51 = vld [vmem:[%s1689_s3 + $0x30] sm:$0xff] }
 0x16e   :  { %v580_v16 = vpop.f32.mrf.mxu3  ;;  %v786_v54 = vld [vmem:[%s1689_s3 + $0xb0] sm:$0xff]  ;;  %809 = vmatpush.msrb.mxu2 %v770_v51 }
 0x16f   :  { %v581_v61 = vadd.f32 %v580_v16, %v371_v13  ;;  %v275_v12 = vpop.f32.mrf.mxu0  ;;  %v659_v0 = vadd.f32 %v1514_v52, %v639_v57  ;;  %829 = vmatpush.msrb.mxu3 %v786_v54 }
 0x170   :  { %v484_v2 = vpop.f32.mrf.mxu1 }
 0x171   :  { %v485_v8 = vadd.f32 %v484_v2, %v275_v12  ;;  %v675_v9 = vmax.f32 %v659_v0, 0.0  ;;  %v624_v41 = vmax.f32 %v1390_v6, %v581_v61 }
 0x173   :  { %v608_v22 = vmax.f32 %v1404_v17, %v485_v8  ;;  %728 = vrot.lane.b32.xlu1 %v675_v9, %s887_s15 }
 0x175   :  { %v640_v55 = vmax.f32 %v608_v22, %v624_v41  ;;  %v374_v1 = vpop.f32.mrf.mxu2  ;;  %v769_v41 = vld [vmem:[%s1689_s3 + $0x28] sm:$0xff] }
 0x176   :  { %v583_v59 = vpop.f32.mrf.mxu3  ;;  %v785_v22 = vld [vmem:[%s1689_s3 + $0xa8] sm:$0xff]  ;;  %810 = vmatpush.msrb.mxu2 %v769_v41 }
 0x177   :  { %v584_v62 = vadd.f32 %v583_v59, %v374_v1  ;;  %v278_v44 = vpop.f32.mrf.mxu0  ;;  %v660_v6 = vadd.f32 %v1514_v52, %v640_v55  ;;  %830 = vmatpush.msrb.mxu3 %v785_v22 }
 0x178   :  { %v487_v17 = vpop.f32.mrf.mxu1 }
 0x179   :  { %v488_v58 = vadd.f32 %v487_v17, %v278_v44  ;;  %v676_v10 = vmax.f32 %v660_v6, 0.0  ;;  %v625_v40 = vmax.f32 %v1406_v20, %v584_v62 }
 0x17b   :  { %v609_v14 = vmax.f32 %v1420_v33, %v488_v58  ;;  %733 = vrot.lane.b32.xlu2 %v676_v10, %s888_s19  ;;  %v407_v10 = vadd.f32 %v1220_v35, %v1212_v32 }
 0x17d   :  { %v641_v18 = vmax.f32 %v609_v14, %v625_v40  ;;  %v377_v23 = vpop.f32.mrf.mxu2 }
 0x17e   :  { %v586_v4 = vpop.f32.mrf.mxu3 }
 0x17f   :  { %v587_v7 = vadd.f32 %v586_v4, %v377_v23  ;;  %v281_v3 = vpop.f32.mrf.mxu0  ;;  %v661_v24 = vadd.f32 %v1514_v52, %v641_v18  ;;  %v598_v18 = vmax.f32 %v407_v10, %v1500_v15  ;;  %v768_v4 = vld [vmem:[%s1689_s3 + $0x20] sm:$0xff] }
 0x180   :  { %v490_v26 = vpop.f32.mrf.mxu1  ;;  %811 = vmatpush.msrb.mxu2 %v768_v4 }
 0x181   :  { %v491_v31 = vadd.f32 %v490_v26, %v281_v3  ;;  %v677_v36 = vmax.f32 %v661_v24, 0.0  ;;  %v626_v30 = vmax.f32 %v1422_v38, %v587_v7  ;;  %v784_v7 = vld [vmem:[%s1689_s3 + $0xa0] sm:$0xff]  ;;  %v766_v24 = vld [vmem:[%s1689_s3 + $0x10] sm:$0xff]  ;;  %v765_v26 = vld [vmem:[%s1689_s3 + $0x8] sm:$0xff] }
 0x182   :  { %831 = vmatpush.msrb.mxu3 %v784_v7 }
 0x183   :  { %v610_v27 = vmax.f32 %v1436_v56, %v491_v31  ;;  %738 = vrot.lane.b32.xlu1 %v677_v36, %s889_s20  ;;  %v764_v31 = vld [vmem:[%s1689_s3] sm:$0xff]  ;;  %v783_v36 = vld [vmem:[%s1689_s3 + $0x98] sm:$0xff] }
 0x184   :  { %832 = vmatpush.msrb.mxu3 %v783_v36 }
 0x185   :  { %v642_v20 = vmax.f32 %v610_v27, %v626_v30  ;;  %v380_v33 = vpop.f32.mrf.mxu2 }
 0x186   :  { %v589_v49 = vpop.f32.mrf.mxu3 }
 0x187   :  { %v590_v28 = vadd.f32 %v589_v49, %v380_v33  ;;  %v284_v39 = vpop.f32.mrf.mxu0  ;;  %v662_v38 = vadd.f32 %v1514_v52, %v642_v20  ;;  %v782_v20 = vld [vmem:[%s1689_s3 + $0x90] sm:$0xff] }
 0x188   :  { %v493_v56 = vpop.f32.mrf.mxu1  ;;  %833 = vmatpush.msrb.mxu3 %v782_v20 }
 0x189   :  { %v494_v42 = vadd.f32 %v493_v56, %v284_v39  ;;  %v678_v43 = vmax.f32 %v662_v38, 0.0  ;;  %v627_v47 = vmax.f32 %v1441_v63, %v590_v28  ;;  %v780_v39 = vld [vmem:[%s1689_s3 + $0x80] sm:$0xff] }
 0x18a   :  { %834 = vmatpush.msrb.mxu3 %v781_v53 }
 0x18b   :  { %v611_v29 = vmax.f32 %v1455_v11, %v494_v42  ;;  %743 = vrot.lane.b32.xlu0 %v678_v43, %s890_s25 }
 0x18c   :  { %835 = vmatpush.msrb.mxu3 %v780_v39 }
 0x18d   :  { %v643_v37 = vmax.f32 %v611_v29, %v627_v47  ;;  %v383_v45 = vpop.f32.mrf.mxu2 }
 0x18e   :  { %v592_v46 = vpop.f32.mrf.mxu3 }
 0x18f   :  { %v593_v57 = vadd.f32 %v592_v46, %v383_v45  ;;  %v287_v13 = vpop.f32.mrf.mxu0  ;;  %v663_v16 = vadd.f32 %v1514_v52, %v643_v37  ;;  %v886_v37 = vld [vmem:[%s1690_s4] ss:$0 sm:$0xff] }
 0x190   :  { %v496_v63 = vpop.f32.mrf.mxu1 }
 0x191   :  { %v497_v11 = vadd.f32 %v496_v63, %v287_v13  ;;  %v679_v61 = vmax.f32 %v663_v16, 0.0  ;;  %v628_v12 = vmax.f32 %v1460_v19, %v593_v57 }
 0x193   :  { %v612_v0 = vmax.f32 %v1474_v34, %v497_v11  ;;  %748 = vrot.lane.b32.xlu2 %v679_v61, %s891_s26 }
 0x195   :  { %v644_v2 = vmax.f32 %v612_v0, %v628_v12  ;;  %v386_v8 = vpop.f32.mrf.mxu2 }
 0x196   :  { %v595_v9 = vpop.f32.mrf.mxu3 }
 0x197   :  { %v596_v55 = vadd.f32 %v595_v9, %v386_v8  ;;  %v290_v1 = vpop.f32.mrf.mxu0  ;;  %v664_v25 = vadd.f32 %v1514_v52, %v644_v2 }
 0x198   :  { %v499_v19 = vpop.f32.mrf.mxu1 }
 0x199   :  { %v500_v34 = vadd.f32 %v499_v19, %v290_v1  ;;  %v680_v21 = vmax.f32 %v664_v25, 0.0  ;;  %v629_v59 = vmax.f32 %v1479_v48, %v596_v55 }
 0x19b   :  { %v613_v62 = vmax.f32 %v1487_v60, %v500_v34  ;;  %753 = vrot.lane.b32.xlu0 %v680_v21, %s892_s6 }
 0x19d   :  { %v645_v44 = vmax.f32 %v613_v62, %v629_v59 }
 0x19f   :  { %v293_v6 = vpop.f32.mrf.mxu0  ;;  %v665_v17 = vadd.f32 %v1514_v52, %v645_v44 }
 0x1a0   :  { %v502_v58 = vpop.f32.mrf.mxu1 }
 0x1a1   :  { %v503_v40 = vadd.f32 %v502_v58, %v293_v6  ;;  %v681_v14 = vmax.f32 %v665_v17, 0.0 }
 0x1a3   :  { %v614_v23 = vmax.f32 %v503_v40, %v1492_v5  ;;  %758 = vrot.lane.b32.xlu1 %v681_v14, %s893_s7 }
 0x1a5   :  { %v630_v48 = vmax.f32 %v598_v18, %v614_v23  ;;  %v686_v60 = vpop.permute.xlu0 %685  ;;  %v704_v3 = vpop.permute.xlu2 %703 }
 0x1a7   :  { %v650_v32 = vadd.f32 %v1514_v52, %v630_v48  ;;  %v767_v52 = vld [vmem:[%s1689_s3 + $0x18] sm:$0xff] }
 0x1a8   :  { %812 = vmatpush.msrb.mxu2 %v767_v52 }
 0x1a9   :  { %v666_v35 = vmax.f32 %v650_v32, 0.0 }
 0x1aa   :  { %813 = vmatpush.msrb.mxu2 %v766_v24 }
 0x1ab   :  { %683 = vst.msk [vmem:[#allocation2] sm:$0xff] %vm682_vm0, %v666_v35 }
 0x1ac   :  { %689 = vst.msk [vmem:[#allocation2] sm:$0xff] %vm688_vm1, %v686_v60  ;;  %814 = vmatpush.msrb.mxu2 %v765_v26 }
 0x1ad   :  { %v692_v5 = vpop.permute.xlu0 %691 }
 0x1ae   :  { %695 = vst.msk [vmem:[#allocation2] sm:$0xff] %vm694_vm2, %v692_v5  ;;  %815 = vmatpush.msrb.mxu2 %v764_v31 }
 0x1b5   :  { %v698_v15 = vpop.permute.xlu1 %697  ;;  %v716_v27 = vpop.permute.xlu2 %715 }
 0x1b6   :  { %701 = vst.msk [vmem:[#allocation2] sm:$0xff] %vm700_vm3, %v698_v15 }
 0x1b7   :  { %707 = vst.msk [vmem:[#allocation2] sm:$0xff] %vm706_vm4, %v704_v3 }
 0x1c5   :  { %v710_v30 = vpop.permute.xlu0 %709 }
 0x1c6   :  { %713 = vst.msk [vmem:[#allocation2] sm:$0xff] %vm712_vm5, %v710_v30 }
 0x1c7   :  { %719 = vst.msk [vmem:[#allocation2] sm:$0xff] %vm718_vm6, %v716_v27 }
 0x1d5   :  { %v722_v33 = vpop.permute.xlu1 %721  ;;  %v734_v28 = vpop.permute.xlu2 %733 }
 0x1d6   :  { %725 = vst.msk [vmem:[#allocation2] sm:$0xff] %vm724_vm7, %v722_v33 }
 0x1dd   :  { %v762_v50 = vld [vmem:[#allocation2] sm:$0xff] }
 0x1de   :  { %816 = vmatmul.f32.vlgmr.msrb.gmra.mxu2 %v762_v50 }
 0x1e5   :  { %v729_v49 = vpop.permute.xlu1 %728 }
 0x1e6   :  { %731 = vst.msk [vmem:[#allocation2 + $0x8] sm:$0xff] %vm688_vm1, %v729_v49 }
 0x1e7   :  { %736 = vst.msk [vmem:[#allocation2 + $0x8] sm:$0xff] %vm694_vm2, %v734_v28 }
 0x1ed   :  { %v749_v42 = vpop.permute.xlu2 %748 }
 0x1f5   :  { %v739_v38 = vpop.permute.xlu1 %738 }
 0x1f6   :  { %741 = vst.msk [vmem:[#allocation2 + $0x8] sm:$0xff] %vm700_vm3, %v739_v38 }
 0x1fd   :  { %v744_v56 = vpop.permute.xlu0 %743 }
 0x1fe   :  { %746 = vst.msk [vmem:[#allocation2 + $0x8] sm:$0xff] %vm706_vm4, %v744_v56 }
 0x1ff   :  { %751 = vst.msk [vmem:[#allocation2 + $0x8] sm:$0xff] %vm712_vm5, %v749_v42 }
 0x20d   :  { %v754_v43 = vpop.permute.xlu0 %753 }
 0x20e   :  { %756 = vst.msk [vmem:[#allocation2 + $0x8] sm:$0xff] %vm718_vm6, %v754_v43 }
 0x215   :  { %v759_v47 = vpop.permute.xlu1 %758 }
 0x216   :  { %761 = vst.msk [vmem:[#allocation2 + $0x8] sm:$0xff] %vm724_vm7, %v759_v47 }
 0x21d   :  { %v763_v29 = vld [vmem:[#allocation2 + $0x8] sm:$0xff] }
 0x21e   :  { %836 = vmatmul.f32.vlgmr.msrb.gmra.mxu3 %v763_v29 }
 0x261   :  { %v817_v45 = vpop.f32.mrf.mxu2 }
 0x262   :  { %v818_v46 = vadd.f32 %v886_v37, %v817_v45 }
 0x2a1   :  { %v837_v51 = vpop.f32.mrf.mxu3 }
 0x2a2   :  { %v838_v54 = vadd.f32 %v837_v51, %v818_v46 }
 0x2a4   :  { %v840_v57 = vmax.f32 %v838_v54, 0.0 }
 0x2a6   :  { %841 = vst [vmem:[%s1691_s5] sm:$0xff] %v840_v57 }

</bundles_post_ra>
